<compile_context>
chip_gen: v7x
topology: tpu7x:2x2x1
jax: 0.10.0
libtpu: 0.0.40
codegen_flags: <defaults>
</compile_context>

<pallas_src>
import jax
import jax.numpy as jnp
import numpy as np
from jax.experimental import pallas as pl
from jax.experimental.pallas import tpu as pltpu

EMB = 128          # embedding_dim
HID = 128          # hidden width of the likelihood MLP
STATE = 3          # SE(2) state dim
PE_K = 8           # padded encoded-particle dim fed to the MXU: x, y, sin, cos, 1, 0, 0, 0
_PI = np.float32(np.pi)


def _wrap_angle(a):
    # wrap to [-pi, pi)
    two_pi = 2.0 * _PI
    return a - two_pi * jnp.floor((a + _PI) / two_pi)


def dpf_se2_kernel(p_ref, w1e_ref, act_ref, w2_ref, b2_ref, w3_ref, b3_ref,
                   newp_ref, lik_ref, pe_ref):
    """One (batch b, particle-tile i) step of motion + measurement update.

    p_ref    : (1, 3, TN)   VMEM  particles tile (state on sublanes, particles on lanes)
    w1e_ref  : (1, HID, 8)  VMEM  bf16 per-batch effective layer-1 weight
                                  (mean/std normalization and encoding bias folded in)
    act_ref  : (3*B,)       SMEM  flattened actions (scalar reads)
    w2_ref   : (HID, HID)   VMEM  bf16
    b2_ref   : (HID, 1)     VMEM  f32
    w3_ref   : (1, HID)     VMEM  bf16
    b3_ref   : (1, 1)       VMEM  f32
    newp_ref : (1, 3, TN)   motion-updated particles
    lik_ref  : (1, 1, TN)   per-particle observation likelihood
    pe_ref   : (8, TN)      VMEM scratch, encoded-particle slab for the layer-1 matmul
    """
    b = pl.program_id(0)

    p = p_ref[0]                                   # (3, TN) f32
    x, y, th = p[0:1, :], p[1:2, :], p[2:3, :]     # each (1, TN)
    tn = x.shape[1]

    # scalar reads (SMEM) — broadcast over lanes on the VPU
    ax = act_ref[3 * b]
    ay = act_ref[3 * b + 1]
    ath = act_ref[3 * b + 2]

    sin_t = jnp.sin(th)
    cos_t = jnp.cos(th)

    # ---- motion_update (learn_transition_model=False path), all f32 ----
    newp_ref[0, 0:1, :] = x + ax * cos_t - ay * sin_t
    newp_ref[0, 1:2, :] = y + ax * sin_t + ay * cos_t
    newp_ref[0, 2:3, :] = _wrap_angle(th + ath)

    # ---- measurement_update: build the (8, TN) encoded-particle slab ----
    # Rows: x, y, sin(th), cos(th), 1  (normalization/bias folded into w1_eff),
    # rows 5..7 are zero padding (matching zero columns of w1_eff).
    pe_ref[0:1, :] = x
    pe_ref[1:2, :] = y
    pe_ref[2:3, :] = sin_t
    pe_ref[3:4, :] = cos_t
    pe_ref[4:5, :] = jnp.ones((1, tn), jnp.float32)
    pe_ref[5:8, :] = jnp.zeros((3, tn), jnp.float32)
    pe = pe_ref[...].astype(jnp.bfloat16)          # (8, TN) bf16

    # ---- layer 1 on the MXU (K=8), bf16 inputs, f32 accumulation ----
    h1 = jnp.dot(w1e_ref[0], pe, preferred_element_type=jnp.float32)    # (HID, TN)
    h1 = jnp.maximum(h1, 0.0)

    # ---- layer 2: MXU, bf16 inputs, f32 accumulation ----
    h2 = jnp.dot(w2_ref[...], h1.astype(jnp.bfloat16),
                 preferred_element_type=jnp.float32) + b2_ref[...]
    h2 = jnp.maximum(h2, 0.0)                      # (HID, TN)

    # ---- layer 3 + sigmoid ----
    logit = jnp.dot(w3_ref[...], h2.astype(jnp.bfloat16),
                    preferred_element_type=jnp.float32) + b3_ref[...]   # (1, TN)
    lik_ref[0] = jax.nn.sigmoid(logit)


def _pick_tile(n, b, cap=4096):
    assert n % 128 == 0, "number of particles must be a multiple of 128"
    t = min(n, cap)
    if b == 1 and n >= 256:
        # v7x has 2 TensorCores: guarantee >= 2 parallel grid steps even at B == 1.
        t = min(t, n // 2)
    t = max(128, (t // 128) * 128)
    while n % t:
        t -= 128
    return t


def _dpf_se2_call(particles_t, action, encoding, means, stds, params):
    """Core call.  particles_t: [B, 3, N] (layout-resident; no transposes)."""
    B, _, N = particles_t.shape
    tile_n = _pick_tile(N, B)

    # ---- per-batch effective layer-1 weight (tiny [B, HID, 8]), built once in XLA ----
    # h1 = w1a0*(x-mx)/sx + w1a1*(y-my)/sy + w1a2*sin + w1a3*cos + (w1b@enc + b1)
    #    = c0*x + c1*y + c2*sin + c3*cos + c4*1
    w1a = params["w1a"]                                                   # (HID, 4)
    bias_eff = encoding @ params["w1b"].T + params["b1"][:, 0][None, :]   # (B, HID)
    inv_sx = 1.0 / stds[:, 0, 0]                                          # (B,)
    inv_sy = 1.0 / stds[:, 0, 1]
    mx = means[:, 0, 0]
    my = means[:, 0, 1]
    c0 = w1a[None, :, 0] * inv_sx[:, None]                                # (B, HID)
    c1 = w1a[None, :, 1] * inv_sy[:, None]
    c2 = jnp.broadcast_to(w1a[None, :, 2], (B, HID))
    c3 = jnp.broadcast_to(w1a[None, :, 3], (B, HID))
    c4 = bias_eff - c0 * mx[:, None] - c1 * my[:, None]
    w1_eff = jnp.concatenate(
        [jnp.stack([c0, c1, c2, c3, c4], axis=-1),
         jnp.zeros((B, HID, PE_K - 5), jnp.float32)],
        axis=-1).astype(jnp.bfloat16)                                     # (B, HID, 8)

    act_flat = action.reshape(-1).astype(jnp.float32)                     # (3B,) -> SMEM
    w2_bf = params["w2"].astype(jnp.bfloat16)
    w3_bf = params["w3"].astype(jnp.bfloat16)

    grid = (B, N // tile_n)
    wmap = lambda b, i: (0, 0)
    smem = pl.BlockSpec(memory_space=pltpu.MemorySpace.SMEM)

    new_p_t, lik = pl.pallas_call(
        dpf_se2_kernel,
        out_shape=(jax.ShapeDtypeStruct((B, 3, N), jnp.float32),
                   jax.ShapeDtypeStruct((B, 1, N), jnp.float32)),
        grid_spec=pltpu.PrefetchScalarGridSpec(
            num_scalar_prefetch=0,
            grid=grid,
            in_specs=[
                pl.BlockSpec((1, 3, tile_n), lambda b, i: (b, 0, i)),   # particles
                pl.BlockSpec((1, HID, PE_K), lambda b, i: (b, 0, 0)),   # w1_eff (bf16)
                smem,                                                   # action (flat)
                pl.BlockSpec((HID, HID), wmap),                         # w2  (bf16)
                pl.BlockSpec((HID, 1),   wmap),                         # b2  (f32)
                pl.BlockSpec((1, HID),   wmap),                         # w3  (bf16)
                pl.BlockSpec((1, 1),     wmap),                         # b3  (f32)
            ],
            out_specs=[
                pl.BlockSpec((1, 3, tile_n), lambda b, i: (b, 0, i)),
                pl.BlockSpec((1, 1, tile_n), lambda b, i: (b, 0, i)),
            ],
            scratch_shapes=[pltpu.VMEM((PE_K, tile_n), jnp.float32)],
        ),
        # update particles in place (no fresh [B,3,N] HBM allocation per filter step)
        input_output_aliases={0: 0},
        compiler_params=pltpu.CompilerParams(
            dimension_semantics=("parallel", "parallel"),
            vmem_limit_bytes=32 * 1024 * 1024),
    )(particles_t, w1_eff, act_flat, w2_bf, params["b2"], w3_bf, params["b3"])

    return new_p_t, lik[:, 0, :]


# Primary entry point for a per-timestep filter loop: keep particles as [B, 3, N]
# (lane-dense) across timesteps to avoid two full HBM transpose passes per step.
# For true in-place reuse of the caller's particle buffer, jit the caller with
# donate_argnums on the particle argument.
dpf_se2_step_resident = jax.jit(_dpf_se2_call)


@jax.jit
def dpf_se2_step(particles, action, encoding, means, stds, params):
    """PyTorch-layout convenience wrapper (one-off conversions outside the loop).

    particles: [B,N,3]  action: [B,3]  encoding: [B,EMB]  means/stds: [B,1,3]
    NOTE: the two transposes below each add a full HBM pass over the particle
    array; prefer dpf_se2_step_resident ([B,3,N]) in a per-timestep loop.
    """
    p_t = jnp.transpose(particles, (0, 2, 1))             # [B, 3, N]
    new_p_t, lik = _dpf_se2_call(p_t, action, encoding, means, stds, params)
    return jnp.transpose(new_p_t, (0, 2, 1)), lik


def make_params(key):
    ks = jax.random.split(key, 6)
    scale = 0.1
    return {
        "w1a": scale * jax.random.normal(ks[0], (HID, 4), jnp.float32),
        "w1b": scale * jax.random.normal(ks[1], (HID, EMB), jnp.float32),
        "b1":  jnp.zeros((HID, 1), jnp.float32),
        "w2":  scale * jax.random.normal(ks[2], (HID, HID), jnp.float32),
        "b2":  jnp.zeros((HID, 1), jnp.float32),
        "w3":  scale * jax.random.normal(ks[3], (1, HID), jnp.float32),
        "b3":  jnp.zeros((1, 1), jnp.float32),
    }


def reference(particles, action, encoding, means, stds, params):
    """Pure-JAX f32 reference of the same (intended) semantics, for verification."""
    x, y, th = particles[..., 0], particles[..., 1], particles[..., 2]
    ax, ay, ath = action[:, None, 0], action[:, None, 1], action[:, None, 2]
    sin_t, cos_t = jnp.sin(th), jnp.cos(th)
    new_x = x + ax * cos_t - ay * sin_t
    new_y = y + ax * sin_t + ay * cos_t
    new_th = _wrap_angle(th + ath)
    new_p = jnp.stack([new_x, new_y, new_th], axis=-1)

    nx = (x - means[:, :, 0]) / stds[:, :, 0]
    ny = (y - means[:, :, 1]) / stds[:, :, 1]
    pe = jnp.stack([nx, ny, sin_t, cos_t], axis=-1)                     # [B,N,4]
    h1 = jnp.maximum(pe @ params["w1a"].T
                     + (encoding @ params["w1b"].T)[:, None, :]
                     + params["b1"].T, 0.0)
    h2 = jnp.maximum(h1 @ params["w2"].T + params["b2"].T, 0.0)
    logit = h2 @ params["w3"].T + params["b3"]
    return new_p, jax.nn.sigmoid(logit)[..., 0]


if __name__ == "__main__":
    key = jax.random.PRNGKey(0)
    k_par, k_act, k_enc, k_w = jax.random.split(key, 4)

    B, N = 2, 512
    particles = jax.random.uniform(k_par, (B, N, STATE), jnp.float32,
                                   minval=-1.0, maxval=1.0) * jnp.array([5.0, 5.0, np.pi],
                                                                        jnp.float32)
    action = 0.1 * jax.random.normal(k_act, (B, STATE), jnp.float32)
    encoding = jax.random.normal(k_enc, (B, EMB), jnp.float32)
    means = jnp.zeros((B, 1, STATE), jnp.float32)
    stds = jnp.ones((B, 1, STATE), jnp.float32) * jnp.array([2.0, 2.0, 1.0], jnp.float32)
    params = make_params(k_w)

    # torch-layout path
    new_p, lik = dpf_se2_step(particles, action, encoding, means, stds, params)
    jax.block_until_ready((new_p, lik))

    # layout-resident path (primary per-timestep API) — must agree with the above
    p_t = jnp.transpose(particles, (0, 2, 1))
    new_p_t, lik_r = dpf_se2_step_resident(p_t, action, encoding, means, stds, params)
    jax.block_until_ready((new_p_t, lik_r))

    ref_p, ref_lik = reference(particles, action, encoding, means, stds, params)
    # Motion update is pure f32 element-wise math -> tight tolerance.
    np.testing.assert_allclose(np.asarray(new_p), np.asarray(ref_p), rtol=1e-5, atol=1e-5)
    np.testing.assert_allclose(np.asarray(jnp.transpose(new_p_t, (0, 2, 1))),
                               np.asarray(ref_p), rtol=1e-5, atol=1e-5)
    # Likelihood MLP runs its matmuls in bf16 (f32 accumulation) -> relaxed tolerance
    # against the f32 reference.
    np.testing.assert_allclose(np.asarray(lik), np.asarray(ref_lik), rtol=2e-2, atol=2e-2)
    np.testing.assert_allclose(np.asarray(lik_r), np.asarray(ref_lik), rtol=2e-2, atol=2e-2)

    print("KERNEL_OK")
</pallas_src>

<mosaic_0001>
module attributes {stable_mosaic.version = 11 : i64} {
  func.func @dpf_se2_kernel(%arg0: i32, %arg1: i32, %arg2: memref<1x3x512xf32, #tpu.memory_space<vmem>>, %arg3: memref<1x128x8xbf16, #tpu.memory_space<vmem>>, %arg4: memref<6xf32, #tpu.memory_space<smem>>, %arg5: memref<128x128xbf16, #tpu.memory_space<vmem>>, %arg6: memref<128x1xf32, #tpu.memory_space<vmem>>, %arg7: memref<1x128xbf16, #tpu.memory_space<vmem>>, %arg8: memref<1x1xf32, #tpu.memory_space<vmem>>, %arg9: memref<1x3x512xf32, #tpu.memory_space<vmem>>, %arg10: memref<1x1x512xf32, #tpu.memory_space<vmem>>, %arg11: memref<8x512xf32, #tpu.memory_space<vmem>>) attributes {dimension_semantics = [#tpu.dimension_semantics<parallel>, #tpu.dimension_semantics<parallel>], iteration_bounds = array<i64: 2, 1>, scalar_prefetch = 0 : i64, scratch_operands = 1 : i64, tpu.core_type = #tpu.core_type<tc>, window_params = [{transform_indices = @transform_0, window_bounds = array<i64: 1, 3, 512>}, {transform_indices = @transform_1, window_bounds = array<i64: 1, 128, 8>}, {transform_indices = @transform_2, window_bounds = array<i64: 6>}, {pipeline_mode = #tpu.pipeline_mode<synchronous>, transform_indices = @transform_3, window_bounds = array<i64: 128, 128>}, {pipeline_mode = #tpu.pipeline_mode<synchronous>, transform_indices = @transform_4, window_bounds = array<i64: 128, 1>}, {pipeline_mode = #tpu.pipeline_mode<synchronous>, transform_indices = @transform_5, window_bounds = array<i64: 1, 128>}, {pipeline_mode = #tpu.pipeline_mode<synchronous>, transform_indices = @transform_6, window_bounds = array<i64: 1, 1>}, {transform_indices = @transform_7, window_bounds = array<i64: 1, 3, 512>}, {transform_indices = @transform_8, window_bounds = array<i64: 1, 1, 512>}]} {
    %c0 = arith.constant 0 : index
    %c0_0 = arith.constant 0 : index
    %c0_1 = arith.constant 0 : index
    %0 = vector.load %arg2[%c0, %c0_0, %c0_1] : memref<1x3x512xf32, #tpu.memory_space<vmem>>, vector<1x3x512xf32>
    %1 = vector.shape_cast %0 : vector<1x3x512xf32> to vector<3x512xf32>
    %2 = vector.extract_strided_slice %1 {offsets = [0, 0], sizes = [1, 512], strides = [1, 1]} : vector<3x512xf32> to vector<1x512xf32>
    %3 = vector.extract_strided_slice %1 {offsets = [1, 0], sizes = [1, 512], strides = [1, 1]} : vector<3x512xf32> to vector<1x512xf32>
    %4 = vector.extract_strided_slice %1 {offsets = [2, 0], sizes = [1, 512], strides = [1, 1]} : vector<3x512xf32> to vector<1x512xf32>
    %c3_i32 = arith.constant 3 : i32
    %5 = arith.muli %c3_i32, %arg0 : i32
    %6 = arith.index_cast %5 : i32 to index
    %7 = memref.load %arg4[%6] : memref<6xf32, #tpu.memory_space<smem>>
    %c3_i32_2 = arith.constant 3 : i32
    %8 = arith.muli %c3_i32_2, %arg0 : i32
    %c1_i32 = arith.constant 1 : i32
    %9 = arith.addi %8, %c1_i32 : i32
    %10 = arith.index_cast %9 : i32 to index
    %11 = memref.load %arg4[%10] : memref<6xf32, #tpu.memory_space<smem>>
    %c3_i32_3 = arith.constant 3 : i32
    %12 = arith.muli %c3_i32_3, %arg0 : i32
    %c2_i32 = arith.constant 2 : i32
    %13 = arith.addi %12, %c2_i32 : i32
    %14 = arith.index_cast %13 : i32 to index
    %15 = memref.load %arg4[%14] : memref<6xf32, #tpu.memory_space<smem>>
    %16 = math.sin %4 : vector<1x512xf32>
    %17 = math.cos %4 : vector<1x512xf32>
    %18 = vector.broadcast %7 : f32 to vector<1x512xf32>
    %19 = arith.mulf %18, %17 : vector<1x512xf32>
    %20 = arith.addf %2, %19 : vector<1x512xf32>
    %21 = vector.broadcast %11 : f32 to vector<1x512xf32>
    %22 = arith.mulf %21, %16 : vector<1x512xf32>
    %23 = arith.subf %20, %22 : vector<1x512xf32>
    %c0_4 = arith.constant 0 : index
    %c0_5 = arith.constant 0 : index
    %c0_6 = arith.constant 0 : index
    %24 = vector.load %arg9[%c0_4, %c0_5, %c0_6] : memref<1x3x512xf32, #tpu.memory_space<vmem>>, vector<1x1x512xf32>
    %25 = vector.shape_cast %24 : vector<1x1x512xf32> to vector<1x512xf32>
    %26 = vector.shape_cast %23 : vector<1x512xf32> to vector<1x1x512xf32>
    tpu.vector_store %arg9[%c0_4, %c0_5, %c0_6], %26 {strides = array<i32>} : memref<1x3x512xf32, #tpu.memory_space<vmem>>, vector<1x1x512xf32>,
    %27 = vector.broadcast %7 : f32 to vector<1x512xf32>
    %28 = arith.mulf %27, %16 : vector<1x512xf32>
    %29 = arith.addf %3, %28 : vector<1x512xf32>
    %30 = vector.broadcast %11 : f32 to vector<1x512xf32>
    %31 = arith.mulf %30, %17 : vector<1x512xf32>
    %32 = arith.addf %29, %31 : vector<1x512xf32>
    %c0_7 = arith.constant 0 : index
    %c1 = arith.constant 1 : index
    %c0_8 = arith.constant 0 : index
    %33 = vector.load %arg9[%c0_7, %c1, %c0_8] : memref<1x3x512xf32, #tpu.memory_space<vmem>>, vector<1x1x512xf32>
    %34 = vector.shape_cast %33 : vector<1x1x512xf32> to vector<1x512xf32>
    %35 = vector.shape_cast %32 : vector<1x512xf32> to vector<1x1x512xf32>
    tpu.vector_store %arg9[%c0_7, %c1, %c0_8], %35 {strides = array<i32>} : memref<1x3x512xf32, #tpu.memory_space<vmem>>, vector<1x1x512xf32>,
    %36 = vector.broadcast %15 : f32 to vector<1x512xf32>
    %37 = arith.addf %4, %36 : vector<1x512xf32>
    %cst = arith.constant 3.14159274 : f32
    %38 = vector.broadcast %cst : f32 to vector<1x512xf32>
    %39 = arith.addf %37, %38 : vector<1x512xf32>
    %cst_9 = arith.constant 6.28318548 : f32
    %40 = vector.broadcast %cst_9 : f32 to vector<1x512xf32>
    %41 = arith.divf %39, %40 : vector<1x512xf32>
    %42 = math.floor %41 : vector<1x512xf32>
    %cst_10 = arith.constant 6.28318548 : f32
    %43 = vector.broadcast %cst_10 : f32 to vector<1x512xf32>
    %44 = arith.mulf %43, %42 : vector<1x512xf32>
    %45 = arith.subf %37, %44 : vector<1x512xf32>
    %c0_11 = arith.constant 0 : index
    %c2 = arith.constant 2 : index
    %c0_12 = arith.constant 0 : index
    %46 = vector.load %arg9[%c0_11, %c2, %c0_12] : memref<1x3x512xf32, #tpu.memory_space<vmem>>, vector<1x1x512xf32>
    %47 = vector.shape_cast %46 : vector<1x1x512xf32> to vector<1x512xf32>
    %48 = vector.shape_cast %45 : vector<1x512xf32> to vector<1x1x512xf32>
    tpu.vector_store %arg9[%c0_11, %c2, %c0_12], %48 {strides = array<i32>} : memref<1x3x512xf32, #tpu.memory_space<vmem>>, vector<1x1x512xf32>,
    %c0_13 = arith.constant 0 : index
    %c0_14 = arith.constant 0 : index
    %49 = vector.load %arg11[%c0_13, %c0_14] : memref<8x512xf32, #tpu.memory_space<vmem>>, vector<1x512xf32>
    tpu.vector_store %arg11[%c0_13, %c0_14], %2 {strides = array<i32>} : memref<8x512xf32, #tpu.memory_space<vmem>>, vector<1x512xf32>,
    %c1_15 = arith.constant 1 : index
    %c0_16 = arith.constant 0 : index
    %50 = vector.load %arg11[%c1_15, %c0_16] : memref<8x512xf32, #tpu.memory_space<vmem>>, vector<1x512xf32>
    tpu.vector_store %arg11[%c1_15, %c0_16], %3 {strides = array<i32>} : memref<8x512xf32, #tpu.memory_space<vmem>>, vector<1x512xf32>,
    %c2_17 = arith.constant 2 : index
    %c0_18 = arith.constant 0 : index
    %51 = vector.load %arg11[%c2_17, %c0_18] : memref<8x512xf32, #tpu.memory_space<vmem>>, vector<1x512xf32>
    tpu.vector_store %arg11[%c2_17, %c0_18], %16 {strides = array<i32>} : memref<8x512xf32, #tpu.memory_space<vmem>>, vector<1x512xf32>,
    %c3 = arith.constant 3 : index
    %c0_19 = arith.constant 0 : index
    %52 = vector.load %arg11[%c3, %c0_19] : memref<8x512xf32, #tpu.memory_space<vmem>>, vector<1x512xf32>
    tpu.vector_store %arg11[%c3, %c0_19], %17 {strides = array<i32>} : memref<8x512xf32, #tpu.memory_space<vmem>>, vector<1x512xf32>,
    %cst_20 = arith.constant 1.000000e+00 : f32
    %53 = vector.broadcast %cst_20 : f32 to vector<1x512xf32>
    %c4 = arith.constant 4 : index
    %c0_21 = arith.constant 0 : index
    %54 = vector.load %arg11[%c4, %c0_21] : memref<8x512xf32, #tpu.memory_space<vmem>>, vector<1x512xf32>
    tpu.vector_store %arg11[%c4, %c0_21], %53 {strides = array<i32>} : memref<8x512xf32, #tpu.memory_space<vmem>>, vector<1x512xf32>,
    %cst_22 = arith.constant 0.000000e+00 : f32
    %55 = vector.broadcast %cst_22 : f32 to vector<3x512xf32>
    %c5 = arith.constant 5 : index
    %c0_23 = arith.constant 0 : index
    %56 = vector.load %arg11[%c5, %c0_23] : memref<8x512xf32, #tpu.memory_space<vmem>>, vector<3x512xf32>
    tpu.vector_store %arg11[%c5, %c0_23], %55 {strides = array<i32>} : memref<8x512xf32, #tpu.memory_space<vmem>>, vector<3x512xf32>,
    %c0_24 = arith.constant 0 : index
    %c0_25 = arith.constant 0 : index
    %57 = vector.load %arg11[%c0_24, %c0_25] : memref<8x512xf32, #tpu.memory_space<vmem>>, vector<8x512xf32>
    %58 = arith.truncf %57 : vector<8x512xf32> to vector<8x512xbf16>
    %c0_26 = arith.constant 0 : index
    %c0_27 = arith.constant 0 : index
    %c0_28 = arith.constant 0 : index
    %59 = vector.load %arg3[%c0_26, %c0_27, %c0_28] : memref<1x128x8xbf16, #tpu.memory_space<vmem>>, vector<1x128x8xbf16>
    %60 = vector.shape_cast %59 : vector<1x128x8xbf16> to vector<128x8xbf16>
    %cst_29 = arith.constant dense<0.000000e+00> : vector<128x512xf32>
    %61 = tpu.matmul %60, %58, %cst_29 {dimension_numbers = #tpu.dot_dimension_numbers<[1], [0], [0], [1], [0, 0, 1, 1], [], []>} : vector<128x8xbf16>, vector<8x512xbf16>, vector<128x512xf32> -> vector<128x512xf32>
    %cst_30 = arith.constant 0.000000e+00 : f32
    %62 = vector.broadcast %cst_30 : f32 to vector<128x512xf32>
    %63 = arith.maximumf %61, %62 : vector<128x512xf32>
    %c0_31 = arith.constant 0 : index
    %c0_32 = arith.constant 0 : index
    %64 = vector.load %arg5[%c0_31, %c0_32] : memref<128x128xbf16, #tpu.memory_space<vmem>>, vector<128x128xbf16>
    %65 = arith.truncf %63 : vector<128x512xf32> to vector<128x512xbf16>
    %cst_33 = arith.constant dense<0.000000e+00> : vector<128x512xf32>
    %66 = tpu.matmul %64, %65, %cst_33 {dimension_numbers = #tpu.dot_dimension_numbers<[1], [0], [0], [1], [0, 0, 1, 1], [], []>} : vector<128x128xbf16>, vector<128x512xbf16>, vector<128x512xf32> -> vector<128x512xf32>
    %c0_34 = arith.constant 0 : index
    %c0_35 = arith.constant 0 : index
    %67 = vector.load %arg6[%c0_34, %c0_35] : memref<128x1xf32, #tpu.memory_space<vmem>>, vector<128x1xf32>
    %68 = vector.broadcast %67 : vector<128x1xf32> to vector<128x512xf32>
    %69 = arith.addf %66, %68 : vector<128x512xf32>
    %cst_36 = arith.constant 0.000000e+00 : f32
    %70 = vector.broadcast %cst_36 : f32 to vector<128x512xf32>
    %71 = arith.maximumf %69, %70 : vector<128x512xf32>
    %c0_37 = arith.constant 0 : index
    %c0_38 = arith.constant 0 : index
    %72 = vector.load %arg7[%c0_37, %c0_38] : memref<1x128xbf16, #tpu.memory_space<vmem>>, vector<1x128xbf16>
    %73 = arith.truncf %71 : vector<128x512xf32> to vector<128x512xbf16>
    %cst_39 = arith.constant dense<0.000000e+00> : vector<1x512xf32>
    %74 = tpu.matmul %72, %73, %cst_39 {dimension_numbers = #tpu.dot_dimension_numbers<[1], [0], [0], [1], [0, 0, 1, 1], [], []>} : vector<1x128xbf16>, vector<128x512xbf16>, vector<1x512xf32> -> vector<1x512xf32>
    %c0_40 = arith.constant 0 : index
    %c0_41 = arith.constant 0 : index
    %75 = vector.load %arg8[%c0_40, %c0_41] : memref<1x1xf32, #tpu.memory_space<vmem>>, vector<1x1xf32>
    %76 = vector.broadcast %75 : vector<1x1xf32> to vector<1x512xf32>
    %77 = arith.addf %74, %76 : vector<1x512xf32>
    %78 = arith.negf %77 : vector<1x512xf32>
    %79 = math.exp %78 : vector<1x512xf32>
    %cst_42 = arith.constant 1.000000e+00 : f32
    %80 = vector.broadcast %cst_42 : f32 to vector<1x512xf32>
    %81 = arith.addf %80, %79 : vector<1x512xf32>
    %82 = arith.divf %80, %81 : vector<1x512xf32>
    %c0_43 = arith.constant 0 : index
    %c0_44 = arith.constant 0 : index
    %c0_45 = arith.constant 0 : index
    %83 = vector.load %arg10[%c0_43, %c0_44, %c0_45] : memref<1x1x512xf32, #tpu.memory_space<vmem>>, vector<1x1x512xf32>
    %84 = vector.shape_cast %83 : vector<1x1x512xf32> to vector<1x512xf32>
    %85 = vector.shape_cast %82 : vector<1x512xf32> to vector<1x1x512xf32>
    tpu.vector_store %arg10[%c0_43, %c0_44, %c0_45], %85 {strides = array<i32>} : memref<1x1x512xf32, #tpu.memory_space<vmem>>, vector<1x1x512xf32>,
    return
  }
  func.func @transform_0(%arg0: i32, %arg1: i32) -> (i32, i32, i32) {
    %c0_i32 = arith.constant 0 : i32
    %c0_i32_0 = arith.constant 0 : i32
    return %arg0, %c0_i32, %arg1 : i32, i32, i32
  }
  func.func @transform_1(%arg0: i32, %arg1: i32) -> (i32, i32, i32) {
    %c0_i32 = arith.constant 0 : i32
    %c0_i32_0 = arith.constant 0 : i32
    %c0_i32_1 = arith.constant 0 : i32
    return %arg0, %c0_i32, %c0_i32_0 : i32, i32, i32
  }
  func.func @transform_2(%arg0: i32, %arg1: i32) -> i32 {
    %c0_i32 = arith.constant 0 : i32
    %c0_i32_0 = arith.constant 0 : i32
    return %c0_i32 : i32
  }
  func.func @transform_3(%arg0: i32, %arg1: i32) -> (i32, i32) {
    %c0_i32 = arith.constant 0 : i32
    %c0_i32_0 = arith.constant 0 : i32
    %c0_i32_1 = arith.constant 0 : i32
    return %c0_i32, %c0_i32_0 : i32, i32
  }
  func.func @transform_4(%arg0: i32, %arg1: i32) -> (i32, i32) {
    %c0_i32 = arith.constant 0 : i32
    %c0_i32_0 = arith.constant 0 : i32
    %c0_i32_1 = arith.constant 0 : i32
    return %c0_i32, %c0_i32_0 : i32, i32
  }
  func.func @transform_5(%arg0: i32, %arg1: i32) -> (i32, i32) {
    %c0_i32 = arith.constant 0 : i32
    %c0_i32_0 = arith.constant 0 : i32
    %c0_i32_1 = arith.constant 0 : i32
    return %c0_i32, %c0_i32_0 : i32, i32
  }
  func.func @transform_6(%arg0: i32, %arg1: i32) -> (i32, i32) {
    %c0_i32 = arith.constant 0 : i32
    %c0_i32_0 = arith.constant 0 : i32
    %c0_i32_1 = arith.constant 0 : i32
    return %c0_i32, %c0_i32_0 : i32, i32
  }
  func.func @transform_7(%arg0: i32, %arg1: i32) -> (i32, i32, i32) {
    %c0_i32 = arith.constant 0 : i32
    %c0_i32_0 = arith.constant 0 : i32
    return %arg0, %c0_i32, %arg1 : i32, i32, i32
  }
  func.func @transform_8(%arg0: i32, %arg1: i32) -> (i32, i32, i32) {
    %c0_i32 = arith.constant 0 : i32
    %c0_i32_0 = arith.constant 0 : i32
    return %arg0, %c0_i32, %arg1 : i32, i32, i32
  }
}

</mosaic_0001>

<bundles_post_ra>
// kernel: dpf_se2_step.1
= control target key start
LH: loop header
LB: loop body
LE: loop exit
PB: predicated region body
PF: predicated region fallthrough
CT: control target
= control target key end

     0   :  { %s2950_s0 = inlined_call_operand.vmem [shape: f32[2,3,512], index: 0, kind: input, shape index: {}, may-alias: {0,7}]   ;;  %s2951_s1 = inlined_call_operand.vmem [shape: bf16[2,128,8], index: 1, kind: input, shape index: {}]   ;;  %s2952_s2 = inlined_call_operand.vmem [shape: f32[6], index: 2, kind: input, shape index: {}]   ;;  %s2953_s3 = inlined_call_operand.vmem [shape: bf16[128,128], index: 3, kind: input, shape index: {}]   ;;  %s2954_s4 = inlined_call_operand.vmem [shape: f32[128,1], index: 4, kind: input, shape index: {}]   ;;  %s2955_s5 = inlined_call_operand.vmem [shape: bf16[1,128], index: 5, kind: input, shape index: {}]   ;;  %s2956_s6 = inlined_call_operand.<no memory space> [shape: f32[1,1], index: 6, kind: input, shape index: {}]   ;;  %s2957_s7 = inlined_call_operand.vmem [shape: f32[2,3,512], index: 7, kind: output, shape index: {0}, may-alias: {0,7}]   ;;  %s2958_s8 = inlined_call_operand.vmem [shape: f32[2,1,512], index: 8, kind: output, shape index: {1}]  }
   0x1   :  { %v14_v0 = vstv %s2956_s6 }
   0x2   :  { %15 = vst [vmem:[#allocation3] sm:$0x1] %v14_v0 }
   0x3   :  { %16 = vsyncpa [#allocation5], 0  ;;  %s2567_s29 = smov 0   ;;  %s2569_s30 = smov 0  }
   0x4   :  { %s2571_s9 = smov 0  }
   0x5 LB: > { %s2287_s6 = sadd.s32 4294967295, %s2506_s9   ;;  %s34_s10 = sadd.s32 1, %s2502_s30  ;;  %s2506_s9 = sphi %s2571_s9, %s22_s9   ;;  %s2502_s30 = sphi %s2569_s30, %s2964_s30   ;;  %s2498_s29 = sphi %s2567_s29, %s2963_s29  }
   0x6   : > { %p36_p0 = scmp.ge.s32.totalorder %s34_s10, 2  ;;  %p2289_p1 = scmp.ge.s32.totalorder %s2506_s9, 1 }
   0x7   : > { %p254_p2 = scmp.lt.s32.totalorder %s2506_s9, 3  ;;  %p2592_p4 = scmp.eq.s32.totalorder %s2287_s6, 0 }
   0x8   : > { %s2966_s10 = smov (%p36_p0, %s34_s10), 0  ;;  %s267_s15 = sshll.u32 %s2952_s2, 4  ;;  %s268_s15 = int_to_ptr.vmem [resolvable:$true] %s267_s15 }
   0x9   : > { %p2588_p3 = pnand %p2289_p1, %p254_p2  ;;  %s2465_s16 = scalar_lea.vmem %s268_s15, 16 }
   0xa   : > { %p2466_p7 = scmp.ne.s32.totalorder %s268_s15, %s2465_s16  ;;  %p2473_p11 = scmp.lt.s32.totalorder %s268_s15, %s268_s15 }
   0xb   : > { %p2382_p5 = pneg %p2588_p3  ;;  %p2474_p12 = scmp.lt.s32.totalorder %s2465_s16, %s2465_s16 }
   0xd   : > { %p2383_p6 = pnand %p2592_p4, %p2382_p5  ;;  %p2475_p13 = por %p2474_p12, %p2473_p11 }
   0xf   : > { %p2467_p8 = pneg %p2383_p6 }
  0x11   : > { %p2468_p9 = pnand %p2467_p8, %p2466_p7 }
  0x13   : > { %p2469_p10 = pneg %p2468_p9 }
  0x15   : > { %p2476_p0 = pnand %p2475_p13, %p2469_p10 }
  0x17   : > { %2479 = shalt.err (!%p2476_p0)
}
  0x18   : > { %s2508_s17 = smov [#allocation4]   ;;  %313 = sbr.rel (%p2588_p3) target bundleno = 965 (0x3c5), region = 48 }
  0x19   : > { %2385 = dma.vmem_to_smem (!%p2383_p6), %s268_s15, 16, %s2508_s17, [#allocation5]  }
  0x1f   : > { %2493 = dma.done.wait (%p2592_p4), [#allocation5], 16  }
  0x20   : > { %2495 = vsyncadd (%p2592_p4), [#allocation5], 4294967280 }
  0x21   : > { %319 = sfence }
  0x22   : > { %p370_p1 = scmp.lt.s32.totalorder %s2498_s29, 1  ;;  %s2611_s18 = smul.u32 3, %s2498_s29  ;;  %v857_v1 = vlaneseq  ;;  %v2509_v3 = vmov 1.0   ;;  %v2510_v4 = vmov 0.0   ;;  %v2511_v5 = vmov 1966171168  }
  0x23   : > { %1076 = vst [vmem:[#allocation2 + $0x8] sm:$0xe0] %v2510_v4  ;;  %1075 = vst [vmem:[#allocation2] sm:$0xe0] %v2510_v4  ;;  %v855_v6 = vunpack.c.l.s4 %v2511_v5  ;;  %v2512_v7 = vmov 0  }
  0x24   : > { %s2968_s29 = smov (!%p370_p1, %s2498_s29), 1  ;;  %vm2616_vm0 = vcmp.lt.s32.totalorder %v857_v1, 512  ;;  %1077 = vst [vmem:[#allocation2 + $0x10] sm:$0xe0] %v2510_v4  ;;  %1078 = vst [vmem:[#allocation2 + $0x18] sm:$0xe0] %v2510_v4  ;;  %1213 = vmatprep.mubr.bf16.mxu0 %v2512_v7  ;;  %1326 = vmatprep.mubr.bf16.mxu1 %v2512_v7 }
  0x25   : > { %s2367_s19 = sshll.u32 %s2968_s29, 4  ;;  %1073 = vst.msk [vmem:[#allocation2 + $0x4] ss:$8 sm:$0xf] %vm2616_vm0, %v2509_v3  ;;  %s410_s23 = sadd.s32 2, %s2611_s18  ;;  %2423 = vset.pattern.permute.xlu0 %v2512_v7  ;;  %2424 = vset.pattern.permute.xlu1 %v2512_v7  ;;  %v856_v16 = vunpack.c.0.s8 %v855_v6  ;;  %v2649_v17 = vshrl.u32 %v857_v1, 7 }
  0x26   : > { %s377_s22 = scalar_lea.vmem %s2950_s0, %s2367_s19  ;;  %s2368_s24 = sshll.u32 %s2968_s29, 6  ;;  %v2513_v45 = vmov 683565275   ;;  %v2514_v47 = vmov 2475754826  }
  0x27   : > { %v2630_v8 = vld [vmem:[%s377_s22] sm:$0x77]  ;;  %v2632_v9 = vld [vmem:[%s377_s22 + $0x8] sm:$0x77]  ;;  %s411_s25 = sld [smem:[#allocation4 + %s410_s23]]  ;;  %s2643_s28 = scalar_lea.vmem %s2951_s1, %s2368_s24  ;;  %v2654_v25 = vsub.s32 %v856_v16, %v2649_v17 }
  0x28   : > { %v412_v10 = vand.u32 2147483647, %v2630_v8  ;;  %v415_v11 = vand.u32 2139095040, %v2630_v8  ;;  %v516_v12 = vand.u32 2147483647, %v2632_v9  ;;  %v519_v13 = vand.u32 2139095040, %v2632_v9  ;;  %s2752_s12 = scalar_lea.vmem %s2957_s7, %s2367_s19 }
  0x29   : > { %v2668_v32 = vrot.slane %v2630_v8, %v2654_v25  ;;  %v2674_v39 = vrot.slane %v2632_v9, %v2654_v25  ;;  %v2515_v49 = vmov 2131351028   ;;  %v2516_v51 = vmov 2102212464   ;;  %s408_s13 = sadd.s32 1, %s2611_s18  ;;  %s407_s14 = sld [smem:[#allocation4 + %s2611_s18]] }
  0x2a   : > { %v416_v14 = vshrl.u32 %v415_v11, 23  ;;  %v419_v15 = vand.u32 8388607, %v412_v10  ;;  %v520_v18 = vshrl.u32 %v519_v13, 23  ;;  %v523_v19 = vand.u32 8388607, %v516_v12 }
  0x2b   : > { %v2517_v53 = vmov 920167782   ;;  %v2518_v60 = vmov 1326507024   ;;  %v991_v6 = vcombine.low %v2668_v32, %v2674_v39  ;;  %vm414_vm15 = vcmp.lt.s32.totalorder %v2630_v8, 0  ;;  %s409_s15 = sld [smem:[#allocation4 + %s408_s13]] }
  0x2c   : > { %v2301_v20 = vadd.s32 4294967169, %v416_v14  ;;  %v420_v21 = vor.u32 8388608, %v419_v15  ;;  %v2305_v22 = vadd.s32 4294967169, %v520_v18  ;;  %v524_v23 = vor.u32 8388608, %v523_v19 }
  0x2d   : > { %v933_v26 = vstv %s411_s25 }
  0x2e   : > { %v422_v24 = vadd.s32 1, %v2301_v20  ;;  %v2656_v27 = vshll.u32 %v420_v21, 8  ;;  %v526_v28 = vadd.s32 1, %v2305_v22  ;;  %v2659_v29 = vadd.f32 %v933_v26, %v2630_v8 }
  0x2f   : > { %v2662_v30 = vadd.f32 %v933_v26, %v2632_v9  ;;  %v2664_v31 = vshll.u32 %v524_v23, 8 }
  0x30   : > { %vm423_vm1 = vcmp.gt.s32.totalorder %v422_v24, 0  ;;  %vm527_vm2 = vcmp.gt.s32.totalorder %v526_v28, 0  ;;  %v936_v34 = vadd.f32 3.1415927, %v2659_v29 }
  0x31   : > { %v424_v33 = vsel %vm423_vm1, %v422_v24, 0  ;;  %v937_v35 = vadd.f32 3.1415927, %v2662_v30  ;;  %v528_v38 = vsel %vm527_vm2, %v526_v28, 0  ;;  %vm413_vm1 = vcmp.le.f32.partialorder %v412_v10, 0.7853982 }
  0x32   : > { %v425_v36 = vshrl.u32 %v424_v33, 5  ;;  %v426_v37 = vand.u32 31, %v424_v33  ;;  %v2676_v40 = vshrl.u32 %v528_v38, 5  ;;  %v530_v41 = vand.u32 31, %v528_v38 }
  0x33   : > { %v2678_v42 = vmul.f32 0.15915494, %v936_v34  ;;  %v2680_v43 = vmul.f32 0.15915494, %v937_v35  ;;  %vm518_vm2 = vcmp.lt.s32.totalorder %v2632_v9, 0 }
  0x34   : > { %v427_v44 = vsub.s32 32, %v426_v37  ;;  %v429_v46 = vshll.u32 %v2513_v45, %v426_v37  ;;  %v432_v48 = vshll.u32 %v2514_v47, %v426_v37  ;;  %v435_v50 = vshll.u32 %v2515_v49, %v426_v37 }
  0x35   : > { %v438_v52 = vshll.u32 %v2516_v51, %v426_v37  ;;  %v441_v54 = vshll.u32 %v2517_v53, %v426_v37  ;;  %vm444_vm3 = vcmp.lt.s32.totalorder %v425_v36, 1  ;;  %vm445_vm4 = vcmp.lt.s32.totalorder %v425_v36, 2 }
  0x36   : > { %v428_v55 = vshrl.u32 %v2513_v45, %v427_v44  ;;  %v430_v56 = vshrl.u32 %v2514_v47, %v427_v44  ;;  %v433_v57 = vshrl.u32 %v2515_v49, %v427_v44  ;;  %v436_v58 = vshrl.u32 %v2516_v51, %v427_v44 }
  0x37   : > { %v439_v59 = vshrl.u32 %v2517_v53, %v427_v44  ;;  %v442_v61 = vshrl.u32 %v2518_v60, %v427_v44  ;;  %vm446_vm5 = vcmp.lt.s32.totalorder %v425_v36, 3  ;;  %vm447_vm6 = vcmp.lt.s32.totalorder %v425_v36, 4 }
  0x38   : > { %v431_v62 = vor.u32 %v430_v56, %v429_v46  ;;  %v434_v63 = vor.u32 %v433_v57, %v432_v48  ;;  %v437_v0 = vor.u32 %v436_v58, %v435_v50  ;;  %v531_v1 = vsub.s32 32, %v530_v41 }
  0x39   : > { %v440_v3 = vor.u32 %v439_v59, %v438_v52  ;;  %v443_v4 = vor.u32 %v442_v61, %v441_v54  ;;  %v533_v5 = vshll.u32 %v2513_v45, %v530_v41  ;;  %v536_v20 = vshll.u32 %v2514_v47, %v530_v41 }
  0x3a   : > { %v448_v11 = vsel %vm444_vm3, %v428_v55, %v431_v62  ;;  %v449_v13 = vsel %vm447_vm6, %v437_v0, 2102212464  ;;  %v452_v14 = vsel %vm444_vm3, %v431_v62, %v434_v63  ;;  %v456_v15 = vsel %vm444_vm3, %v434_v63, %v437_v0 }
  0x3b   : > { %v450_v16 = vsel %vm446_vm5, %v434_v63, %v449_v13  ;;  %v453_v18 = vsel %vm447_vm6, %v440_v3, 920167782  ;;  %v457_v19 = vsel %vm447_vm6, %v443_v4, 1326507024  ;;  %v532_v23 = vshrl.u32 %v2513_v45, %v531_v1 }
  0x3c   : > { %v454_v21 = vsel %vm446_vm5, %v437_v0, %v453_v18  ;;  %v458_v22 = vsel %vm446_vm5, %v440_v3, %v457_v19  ;;  %v534_v24 = vshrl.u32 %v2514_v47, %v531_v1  ;;  %v451_v26 = vsel %vm445_vm4, %v448_v11, %v450_v16 }
  0x3d   : > { %v455_v28 = vsel %vm445_vm4, %v452_v14, %v454_v21  ;;  %v459_v33 = vsel %vm445_vm4, %v456_v15, %v458_v22  ;;  %v537_v34 = vshrl.u32 %v2515_v49, %v531_v1  ;;  %v539_v45 = vshll.u32 %v2515_v49, %v530_v41 }
  0x3e   : > { %v2694_v35 = vmul.u32.u64.low %v2656_v27, %v459_v33  ;;  %v2695_v37 = vmul.u32.u64.high %v2656_v27, %v459_v33, %v2694_v35  ;;  %v2698_v38 = vmul.u32.u64.low %v2656_v27, %v455_v28  ;;  %v2699_v44 = vmul.u32.u64.high %v2656_v27, %v455_v28, %v2698_v38 }
  0x3f   : > { %v535_v46 = vor.u32 %v534_v24, %v533_v5  ;;  %v538_v48 = vor.u32 %v537_v34, %v536_v20  ;;  %v540_v47 = vshrl.u32 %v2516_v51, %v531_v1  ;;  %v542_v50 = vshll.u32 %v2516_v51, %v530_v41 }
  0x40   : > { %v543_v52 = vshrl.u32 %v2517_v53, %v531_v1  ;;  %v545_v54 = vshll.u32 %v2517_v53, %v530_v41  ;;  %v546_v55 = vshrl.u32 %v2518_v60, %v531_v1  ;;  %v467_v36 = vmul.u32 %v2656_v27, %v451_v26 }
  0x41   : > { %v541_v56 = vor.u32 %v540_v47, %v539_v45  ;;  %vm548_vm7 = vcmp.lt.s32.totalorder %v2676_v40, 1  ;;  %vm549_vm8 = vcmp.lt.s32.totalorder %v2676_v40, 2  ;;  %vm469_vm9 = vc.u32 %v2695_v37, %v2698_v38 }
  0x42   : > { %v470_v57 = vadd.s32 1, %v2699_v44  ;;  %v544_v58 = vor.u32 %v543_v52, %v542_v50  ;;  %vm550_vm10 = vcmp.lt.s32.totalorder %v2676_v40, 3  ;;  %v547_v49 = vor.u32 %v546_v55, %v545_v54 }
  0x43   : > { %vm551_vm11 = vcmp.lt.s32.totalorder %v2676_v40, 4  ;;  %v552_v41 = vsel %vm548_vm7, %v532_v23, %v535_v46  ;;  %v556_v51 = vsel %vm548_vm7, %v535_v46, %v538_v48  ;;  %v560_v60 = vsel %vm548_vm7, %v538_v48, %v541_v56 }
  0x44   : > { %v471_v27 = vsel %vm469_vm9, %v470_v57, %v2699_v44  ;;  %v553_v53 = vsel %vm551_vm11, %v541_v56, 2102212464  ;;  %v557_v59 = vsel %vm551_vm11, %v544_v58, 920167782  ;;  %v561_v0 = vsel %vm551_vm11, %v547_v49, 1326507024 }
  0x45   : > { %v472_v61 = vadd.s32 %v471_v27, %v467_v36  ;;  %v554_v62 = vsel %vm550_vm10, %v538_v48, %v553_v53  ;;  %v558_v63 = vsel %vm550_vm10, %v541_v56, %v557_v59  ;;  %v562_v4 = vsel %vm550_vm10, %v544_v58, %v561_v0 }
  0x46   : > { %v555_v1 = vsel %vm549_vm8, %v552_v41, %v554_v62  ;;  %v559_v3 = vsel %vm549_vm8, %v556_v51, %v558_v63  ;;  %v941_v5 = vfloor.f32 %v2678_v42  ;;  %v563_v13 = vsel %vm549_vm8, %v560_v60, %v562_v4 }
  0x47   : > { %v473_v11 = vadd.s32 536870912, %v472_v61  ;;  %v2719_v14 = vmul.u32.u64.low %v2664_v31, %v559_v3  ;;  %v2720_v15 = vmul.u32.u64.high %v2664_v31, %v559_v3, %v2719_v14  ;;  %v942_v19 = vfloor.f32 %v2680_v43 }
  0x48   : > { %v2723_v16 = vmul.u32.u64.low %v2664_v31, %v563_v13  ;;  %v2724_v18 = vmul.u32.u64.high %v2664_v31, %v563_v13, %v2723_v16  ;;  %v943_v21 = vmul.f32 6.2831855, %v941_v5  ;;  %v998_v22 = vrot.slane %v991_v6, %v2654_v25 }
  0x49   : > { %v2727_v20 = vshrl.u32 %v473_v11, 30  ;;  %v1002_v42 = vcombine.high %v2668_v32, %v2674_v39  ;;  %v571_v40 = vmul.u32 %v2664_v31, %v555_v1  ;;  %v944_v23 = vmul.f32 6.2831855, %v942_v19 }
  0x4a   : > { %v574_v26 = vadd.s32 1, %v2720_v15  ;;  %v945_v28 = vsub.f32 %v2659_v29, %v943_v21  ;;  %1000 = vst.msk [vmem:[#allocation2] ss:$8 sm:$0xf] %vm2616_vm0, %v998_v22  ;;  %vm573_vm12 = vc.u32 %v2724_v18, %v2719_v14  ;;  %v468_v55 = vadd.s32 %v2698_v38, %v2695_v37 }
  0x4b   : > { %v475_v24 = vshll.u32 %v2727_v20, 30  ;;  %v946_v43 = vsub.f32 %v2662_v30, %v944_v23  ;;  %v1009_v6 = vrot.slane %v1002_v42, %v2654_v25  ;;  %v572_v0 = vadd.s32 %v2719_v14, %v2724_v18 }
  0x4c   : > { %v575_v31 = vsel %vm573_vm12, %v574_v26, %v2720_v15  ;;  %v955_v39 = vrot.slane %v945_v28, %v2654_v25  ;;  %v498_v37 = vsub.s32 4, %v2727_v20  ;;  %vm517_vm3 = vcmp.le.f32.partialorder %v516_v12, 0.7853982 }
  0x4d   : > { %v476_v32 = vsub.s32 %v472_v61, %v475_v24  ;;  %v576_v33 = vadd.s32 %v575_v31, %v571_v40  ;;  %v962_v34 = vrot.slane %v946_v43, %v2654_v25  ;;  %1012 = vst.msk [vmem:[#allocation2 + $0x1] ss:$8 sm:$0xf] %vm2616_vm0, %v1009_v6  ;;  %vm504_vm10 = vweird.f32 %v2630_v8 }
  0x4e   : > { %v499_v14 = vsel %vm414_vm15, %v498_v37, %v2727_v20 }
  0x4f   : > { %v478_v29 = vsub.s32 0, %v476_v32  ;;  %v577_v35 = vadd.s32 536870912, %v576_v33  ;;  %v963_v44 = vcombine.low %v955_v39, %v962_v34  ;;  %v501_v42 = vsel %vm413_vm1, 0, %v499_v14 }
  0x50   : > { %v505_v28 = vadd.s32 3, %v501_v42 }
  0x51   : > { %v2302_v46 = vmin.u32 %v478_v29, %v476_v32  ;;  %v578_v48 = vshrl.u32 %v577_v35, 30  ;;  %v970_v30 = vrot.slane %v963_v44, %v2654_v25 }
  0x52   : > { %v506_v6 = vand.u32 3, %v505_v28 }
  0x53   : > { %v480_v45 = vclz %v2302_v46  ;;  %v579_v47 = vshll.u32 %v578_v48, 30  ;;  %v971_v50 = vcombine.high %v970_v30, %v970_v30  ;;  %v602_v26 = vsub.s32 4, %v578_v48 }
  0x54   : > { %vm511_vm4 = vcmp.eq.s32.totalorder %v506_v6, 2  ;;  %vm508_vm6 = vcmp.eq.s32.totalorder %v506_v6, 0  ;;  %vm507_vm8 = vcmp.lt.s32.totalorder %v506_v6, 2 }
  0x55   : > { %v2303_v52 = vadd.s32 4294967294, %v480_v45  ;;  %v580_v54 = vsub.s32 %v576_v33, %v579_v47  ;;  %2326 = vst.msk [vmem:[%s2752_s12 + $0x2] ss:$4 sm:$0xf] %vm2616_vm0, %v971_v50  ;;  %v603_v20 = vsel %vm518_vm2, %v602_v26, %v578_v48  ;;  %v826_v47 = vstv %s407_s14 }
  0x56   : > { %v605_v33 = vsel %vm517_vm3, 0, %v603_v20  ;;  %v839_v50 = vstv %s409_s15 }
  0x57   : > { %vm2304_vm13 = vcmp.lt.s32.totalorder %v2303_v52, 0  ;;  %v582_v56 = vsub.s32 0, %v580_v54  ;;  %v609_v44 = vadd.s32 3, %v605_v33 }
  0x58   : > { %v483_v36 = vsel %vm2304_vm13, 0, %v2303_v52 }
  0x59   : > { %v484_v57 = vsub.s32 32, %v483_v36  ;;  %v485_v58 = vshll.u32 %v476_v32, %v483_v36  ;;  %v488_v49 = vsub.s32 4294967266, %v483_v36  ;;  %v2306_v41 = vmin.u32 %v582_v56, %v580_v54 }
  0x5a   : > { %v713_v32 = vand.u32 3, %v501_v42  ;;  %v816_v36 = vand.u32 3, %v605_v33 }
  0x5b   : > { %v486_v51 = vshrl.u32 %v468_v55, %v484_v57  ;;  %v489_v27 = vadd.s32 127, %v488_v49  ;;  %v584_v53 = vclz %v2306_v41 }
  0x5c   : > { %vm718_vm5 = vcmp.eq.s32.totalorder %v713_v32, 2  ;;  %vm715_vm7 = vcmp.eq.s32.totalorder %v713_v32, 0  ;;  %vm714_vm9 = vcmp.lt.s32.totalorder %v713_v32, 2  ;;  %vm821_vm12 = vcmp.eq.s32.totalorder %v816_v36, 2 }
  0x5d   : > { %v487_v59 = vor.u32 %v486_v51, %v485_v58  ;;  %v490_v60 = vshll.u32 %v489_v27, 23  ;;  %v2307_v61 = vadd.s32 4294967294, %v584_v53 }
  0x5f   : > { %v491_v62 = vor.u32 4788187, %v490_v60  ;;  %v494_v63 = vcvt.s32.f32 %v487_v59  ;;  %vm2308_vm14 = vcmp.lt.s32.totalorder %v2307_v61, 0 }
  0x60   : > { %v587_v38 = vsel %vm2308_vm14, 0, %v2307_v61  ;;  %vm818_vm14 = vcmp.eq.s32.totalorder %v816_v36, 0 }
  0x61   : > { %v492_v1 = vand.u32 2147483647, %v491_v62  ;;  %v588_v3 = vsub.s32 32, %v587_v38  ;;  %v589_v4 = vshll.u32 %v580_v54, %v587_v38  ;;  %v592_v5 = vsub.s32 4294967266, %v587_v38 }
  0x62   : > { %v610_v54 = vand.u32 3, %v609_v44 }
  0x63   : > { %v495_v11 = vmul.f32 %v494_v63, %v492_v1  ;;  %v590_v13 = vshrl.u32 %v572_v0, %v588_v3  ;;  %v593_v15 = vadd.s32 127, %v592_v5 }
  0x64   : > { %vm615_vm11 = vcmp.eq.s32.totalorder %v610_v54, 2  ;;  %vm612_vm13 = vcmp.eq.s32.totalorder %v610_v54, 0 }
  0x65   : > { %v496_v16 = vxor.u32 2147483648, %v495_v11  ;;  %v591_v18 = vor.u32 %v590_v13, %v589_v4  ;;  %v594_v19 = vshll.u32 %v593_v15, 23 }
  0x67   : > { %v497_v21 = vsel %vm414_vm15, %v496_v16, %v495_v11  ;;  %v595_v40 = vor.u32 4788187, %v594_v19  ;;  %v598_v23 = vcvt.s32.f32 %v591_v18  ;;  %vm608_vm15 = vweird.f32 %v2632_v9 }
  0x68   : > { %v500_v22 = vsel %vm413_vm1, %v2630_v8, %v497_v21  ;;  %vm611_vm1 = vcmp.lt.s32.totalorder %v610_v54, 2 }
  0x69   : > { %2441 = vcosq.f32 %v500_v22  ;;  %v596_v24 = vand.u32 2147483647, %v595_v40 }
  0x6a   : > { %2443 = vsinq.f32 %v500_v22 }
  0x6b   : > { %v599_v43 = vmul.f32 %v598_v23, %v596_v24 }
  0x6d   : > { %v600_v10 = vxor.u32 2147483648, %v599_v43 }
  0x6f   : > { %v601_v31 = vsel %vm518_vm2, %v600_v10, %v599_v43  ;;  %vm817_vm2 = vcmp.lt.s32.totalorder %v816_v36, 2 }
  0x70   : > { %v604_v39 = vsel %vm517_vm3, %v2632_v9, %v601_v31  ;;  %vm1168_vm3 = vcmask 1043456  }
  0x71   : > { %2445 = vcosq.f32 %v604_v39 }
  0x72   : > { %2447 = vsinq.f32 %v604_v39 }
  0x73   : > { %v2442_v34 = vpop.eup %2441 }
  0x74   : > { %v2444_v29 = vpop.eup %2443  ;;  %v512_v35 = vxor.u32 2147483648, %v2442_v34 }
  0x75   : > { %v509_v12 = vxor.u32 2147483648, %v2444_v29 }
  0x76   : > { %v513_v46 = vsel %vm511_vm4, %v512_v35, %v2444_v29  ;;  %v720_v48 = vsel %vm718_vm5, %v512_v35, %v2444_v29  ;;  %vm1143_vm4 = vcmask 64512  }
  0x77   : > { %v510_v30 = vsel %vm508_vm6, %v2442_v34, %v509_v12  ;;  %v717_v45 = vsel %vm715_vm7, %v2442_v34, %v509_v12 }
  0x78   : > { %v514_v52 = vsel %vm507_vm8, %v510_v30, %v513_v46  ;;  %v721_v55 = vsel %vm714_vm9, %v717_v45, %v720_v48 }
  0x79   : > { %v515_v56 = vsel %vm504_vm10, nan, %v514_v52  ;;  %v722_v57 = vsel %vm504_vm10, nan, %v721_v55 }
  0x7a   : > { %v827_v58 = vmul.f32 %v826_v47, %v722_v57  ;;  %v882_v49 = vmul.f32 %v826_v47, %v515_v56  ;;  %v840_v41 = vmul.f32 %v839_v50, %v515_v56  ;;  %v894_v51 = vmul.f32 %v839_v50, %v722_v57 }
  0x7b   : > { %v2446_v27 = vpop.eup %2445  ;;  %v1022_v14 = vrot.slane %v515_v56, %v2654_v25  ;;  %v1051_v18 = vrot.slane %v722_v57, %v2654_v25 }
  0x7c   : > { %v2317_v53 = vrot.slane %v827_v58, 10  ;;  %v2321_v59 = vrot.slane %v882_v49, 9  ;;  %v2448_v60 = vpop.eup %2447  ;;  %v616_v61 = vxor.u32 2147483648, %v2446_v27  ;;  %v2319_v1 = vrot.slane %v840_v41, 10 }
  0x7d   : > { %v613_v62 = vxor.u32 2147483648, %v2448_v60  ;;  %v2323_v37 = vrot.slane %v894_v51, 9  ;;  %v2425_v51 = vld [vmem:[%s2643_s28] sm:$0xff]  }
  0x7e   : > { %v617_v63 = vsel %vm615_vm11, %v616_v61, %v2448_v60  ;;  %v823_v0 = vsel %vm821_vm12, %v616_v61, %v2448_v60  ;;  %v837_v4 = vadd.f32 %v2317_v53, %v2630_v8  ;;  %v892_v5 = vadd.f32 %v2321_v59, %v2630_v8  ;;  %v2426_v53 = vld [vmem:[%s2643_s28 + $0x8] sm:$0xff]   ;;  %v2427_v59 = vld [vmem:[%s2643_s28 + $0x10] sm:$0xff]   ;;  %v2428_v60 = vld [vmem:[%s2643_s28 + $0x18] sm:$0xff]  }
  0x7f   : > { %v614_v38 = vsel %vm612_vm13, %v2446_v27, %v613_v62  ;;  %v820_v3 = vsel %vm818_vm14, %v2446_v27, %v613_v62  ;;  %v2429_v61 = vld [vmem:[%s2643_s28 + $0x20] sm:$0xff]   ;;  %v2430_v62 = vld [vmem:[%s2643_s28 + $0x28] sm:$0xff]  }
  0x80   : > { %v618_v11 = vsel %vm611_vm1, %v614_v38, %v617_v63  ;;  %v824_v13 = vsel %vm817_vm2, %v820_v3, %v823_v0  ;;  %v850_v40 = vsub.f32 %v837_v4, %v2319_v1  ;;  %v904_v23 = vadd.f32 %v2323_v37, %v892_v5  ;;  %v2431_v63 = vld [vmem:[%s2643_s28 + $0x30] sm:$0xff]   ;;  %v2432_v0 = vld [vmem:[%s2643_s28 + $0x38] sm:$0xff]   ;;  %v1519_v1 = vld [vmem:[%s2954_s4] sm:$0xff]  ;;  %s2300_s28 = sshll.u32 %s2968_s29, 2 }
  0x81   : > { %v619_v15 = vsel %vm608_vm15, nan, %v618_v11  ;;  %v825_v16 = vsel %vm608_vm15, nan, %v824_v13  ;;  %1537 = vperm.xlu0 %2423, %v1519_v1   ;;  %v1520_v37 = vld [vmem:[%s2954_s4 + $0x8] sm:$0xff]  ;;  %v1523_v38 = vld [vmem:[%s2954_s4 + $0x20] sm:$0xff]  ;;  %v1521_v3 = vld [vmem:[%s2954_s4 + $0x10] sm:$0xff] }
  0x82   : > { %v828_v19 = vmul.f32 %v826_v47, %v825_v16  ;;  %v841_v21 = vmul.f32 %v839_v50, %v619_v15  ;;  %v883_v22 = vmul.f32 %v826_v47, %v619_v15  ;;  %v895_v42 = vmul.f32 %v839_v50, %v825_v16  ;;  %1547 = vperm.xlu1 %2424, %v1521_v3   ;;  %v1525_v4 = vld [vmem:[%s2954_s4 + $0x30] sm:$0xff]  ;;  %v1522_v5 = vld [vmem:[%s2954_s4 + $0x18] sm:$0xff]  ;;  %v1986_v3 = vld [vmem:[#allocation3] sm:$0x1] }
  0x83   : > { %v1029_v24 = vrot.slane %v619_v15, %v2654_v25  ;;  %v1058_v26 = vrot.slane %v825_v16, %v2654_v25  ;;  %v860_v29 = vrot.slane %v850_v40, %v2654_v25  ;;  %v914_v44 = vrot.slane %v904_v23, %v2654_v25  ;;  %v1524_v40 = vld [vmem:[%s2954_s4 + $0x28] sm:$0xff] }
  0x84   : > { %v2318_v28 = vrot.slane %v828_v19, 10  ;;  %v2320_v8 = vrot.slane %v841_v21, 10  ;;  %v2322_v43 = vrot.slane %v883_v22, 9  ;;  %v2324_v10 = vrot.slane %v895_v42, 9  ;;  %v1527_v42 = vld [vmem:[%s2954_s4 + $0x40] sm:$0xff] }
  0x85   : > { %v1030_v20 = vcombine.low %v1022_v14, %v1029_v24  ;;  %v1059_v6 = vcombine.low %v1051_v18, %v1058_v26  ;;  %1542 = vperm.xlu0 %2423, %v1520_v37  }
  0x86   : > { %v838_v32 = vadd.f32 %v2318_v28, %v2632_v9  ;;  %v893_v31 = vadd.f32 %v2322_v43, %v2632_v9  ;;  %1552 = vperm.xlu1 %2424, %v1522_v5  }
  0x87   : > { %v1037_v39 = vrot.slane %v1030_v20, %v2654_v25  ;;  %v1066_v33 = vrot.slane %v1059_v6, %v2654_v25 }
  0x88   : > { %v851_v34 = vsub.f32 %v838_v32, %v2320_v8  ;;  %v905_v35 = vadd.f32 %v2324_v10, %v893_v31 }
  0x89   : > { %v1038_v12 = vcombine.high %v1037_v39, %v1037_v39  ;;  %v1067_v46 = vcombine.high %v1066_v33, %v1066_v33  ;;  %1557 = vperm.xlu0 %2423, %v1523_v38   ;;  %v1529_v39 = vld [vmem:[%s2954_s4 + $0x50] sm:$0xff] }
  0x8a   : > { %v867_v48 = vrot.slane %v851_v34, %v2654_v25  ;;  %v921_v30 = vrot.slane %v905_v35, %v2654_v25  ;;  %1562 = vperm.xlu1 %2424, %v1524_v40   ;;  %v1526_v34 = vld [vmem:[%s2954_s4 + $0x38] sm:$0xff] }
  0x8b   : > { %1041 = vst.msk [vmem:[#allocation2 + $0x2] ss:$8 sm:$0xf] %vm2616_vm0, %v1038_v12  ;;  %1070 = vst.msk [vmem:[#allocation2 + $0x3] ss:$8 sm:$0xf] %vm2616_vm0, %v1067_v46 }
  0x8c   : > { %v868_v9 = vcombine.low %v860_v29, %v867_v48  ;;  %v922_v45 = vcombine.high %v914_v44, %v921_v30 }
  0x8d   : > { %1567 = vperm.xlu0 %2423, %v1525_v4  }
  0x8e   : > { %v875_v47 = vrot.slane %v868_v9, %v2654_v25  ;;  %v929_v50 = vrot.slane %v922_v45, %v2654_v25  ;;  %1572 = vperm.xlu1 %2424, %v1526_v34   ;;  %v1531_v45 = vld [vmem:[%s2954_s4 + $0x60] sm:$0xff] }
  0x90   : > { %881 = vst.msk [vmem:[%s2752_s12] ss:$4 sm:$0xf] %vm2616_vm0, %v875_v47  ;;  %2325 = vst.msk [vmem:[%s2752_s12 + $0x1] ss:$4 sm:$0xf] %vm2616_vm0, %v929_v50  ;;  %s401_s12 = scalar_lea.vmem %s2958_s8, %s2300_s28 }
  0x91   : > { %1577 = vperm.xlu0 %2423, %v1527_v42  }
  0x92   : > { %v1080_v52 = vld [vmem:[#allocation2 + $0x8] sm:$0xff]  ;;  %v1082_v54 = vld [vmem:[#allocation2 + $0x18] sm:$0xff]  ;;  %v1079_v55 = vld [vmem:[#allocation2] sm:$0xff] }
  0x93   : > { %v1084_v36 = vpack.c.bf16 %v1080_v52, %v1080_v52  ;;  %v1086_v56 = vpack.c.bf16 %v1082_v54, %v1082_v54  ;;  %v1083_v57 = vpack.c.bf16 %v1079_v55, %v1079_v55  ;;  %v1081_v58 = vld [vmem:[#allocation2 + $0x10] sm:$0xff] }
  0x94   : > { %v1085_v49 = vpack.c.bf16 %v1081_v58, %v1081_v58 }
  0x95   : > { %2335 = vmatprep.subr.msk.bf16.mxu0 %vm1168_vm3, %v1084_v36  ;;  %2344 = vmatprep.subr.msk.bf16.mxu1 %vm1168_vm3, %v1086_v56  ;;  %v1170_v41 = vsel %vm1168_vm3, %v1083_v57, 0  ;;  %v1528_v36 = vld [vmem:[%s2954_s4 + $0x48] sm:$0xff] }
  0x96   : > { %1182 = vmatpush1.bf16.msra.mxu0 %v1170_v41  ;;  %v1176_v27 = vsel %vm1168_vm3, %v1085_v49, 0  ;;  %1587 = vperm.xlu0 %2423, %v1529_v39  }
  0x97   : > { %1295 = vmatpush1.bf16.msra.mxu1 %v1176_v27  ;;  %1582 = vperm.xlu1 %2424, %v1528_v36   ;;  %v1533_v27 = vld [vmem:[%s2954_s4 + $0x70] sm:$0xff] }
  0x99   : > { %2336 = vmatmul.mubr.msk.bf16.vlgmr.msra.gmra.mrb[0].mxu0 %vm1143_vm4, %v2425_v51 }
  0x9a   : > { %2345 = vmatmul.mubr.msk.bf16.vlgmr.msra.gmra.mrb[0].mxu1 %vm1143_vm4, %v2425_v51  ;;  %1223 = vmatprep.mubr.bf16.mxu0 %v2512_v7 }
  0x9b   : > { %1336 = vmatprep.mubr.bf16.mxu1 %v2512_v7  ;;  %1597 = vperm.xlu0 %2423, %v1531_v45  }
  0x9f   : > { %1607 = vperm.xlu0 %2423, %v1533_v27  }
  0xa1   : > { %2337 = vmatmul.mubr.msk.bf16.gmra.mrb[4].mxu0 %vm1143_vm4, %v2426_v53 }
  0xa2   : > { %2346 = vmatmul.mubr.msk.bf16.gmra.mrb[4].mxu1 %vm1143_vm4, %v2426_v53  ;;  %1233 = vmatprep.mubr.bf16.mxu0 %v2512_v7 }
  0xa3   : > { %1346 = vmatprep.mubr.bf16.mxu1 %v2512_v7  ;;  %1989 = vperm.xlu0 %2423, %v1986_v3  }
  0xa9   : > { %2338 = vmatmul.mubr.msk.bf16.gmra.mrb[8].mxu0 %vm1143_vm4, %v2427_v59 }
  0xaa   : > { %2347 = vmatmul.mubr.msk.bf16.gmra.mrb[8].mxu1 %vm1143_vm4, %v2427_v59  ;;  %1243 = vmatprep.mubr.bf16.mxu0 %v2512_v7  ;;  %v1530_v59 = vld [vmem:[%s2954_s4 + $0x58] sm:$0xff] }
  0xab   : > { %1356 = vmatprep.mubr.bf16.mxu1 %v2512_v7  ;;  %1592 = vperm.xlu1 %2424, %v1530_v59  }
  0xb1   : > { %2339 = vmatmul.mubr.msk.bf16.gmra.mrb[12].mxu0 %vm1143_vm4, %v2428_v60 }
  0xb2   : > { %2348 = vmatmul.mubr.msk.bf16.gmra.mrb[12].mxu1 %vm1143_vm4, %v2428_v60  ;;  %1253 = vmatprep.mubr.bf16.mxu0 %v2512_v7 }
  0xb3   : > { %1366 = vmatprep.mubr.bf16.mxu1 %v2512_v7 }
  0xb9   : > { %2340 = vmatmul.mubr.msk.bf16.gmra.mrb[16].mxu0 %vm1143_vm4, %v2429_v61 }
  0xba   : > { %2349 = vmatmul.mubr.msk.bf16.gmra.mrb[16].mxu1 %vm1143_vm4, %v2429_v61  ;;  %1263 = vmatprep.mubr.bf16.mxu0 %v2512_v7 }
  0xbb   : > { %1376 = vmatprep.mubr.bf16.mxu1 %v2512_v7 }
  0xc1   : > { %2341 = vmatmul.mubr.msk.bf16.gmra.mrb[20].mxu0 %vm1143_vm4, %v2430_v62 }
  0xc2   : > { %2350 = vmatmul.mubr.msk.bf16.gmra.mrb[20].mxu1 %vm1143_vm4, %v2430_v62  ;;  %1273 = vmatprep.mubr.bf16.mxu0 %v2512_v7 }
  0xc3   : > { %1386 = vmatprep.mubr.bf16.mxu1 %v2512_v7 }
  0xc9   : > { %2342 = vmatmul.mubr.msk.bf16.gmra.mrb[24].mxu0 %vm1143_vm4, %v2431_v63 }
  0xca   : > { %2351 = vmatmul.mubr.msk.bf16.gmra.mrb[24].mxu1 %vm1143_vm4, %v2431_v63  ;;  %1283 = vmatprep.mubr.bf16.mxu0 %v2512_v7 }
  0xcb   : > { %1396 = vmatprep.mubr.bf16.mxu1 %v2512_v7 }
  0xd1   : > { %2343 = vmatmul.mubr.msk.bf16.gmra.mrb[28].mxu0 %vm1143_vm4, %v2432_v0 }
  0xd2   : > { %2352 = vmatmul.mubr.msk.bf16.gmra.mrb[28].mxu1 %vm1143_vm4, %v2432_v0  ;;  %1695 = vmatprep.mubr.bf16.mxu0 %v2512_v7 }
  0xd3   : > { %1808 = vmatprep.mubr.bf16.mxu1 %v2512_v7 }
 0x16c   : > { %v1215_v11 = vpop.f32.mrb[0].mxu0 }
 0x16d   : > { %v1328_v13 = vpop.f32.mrb[0].mxu1  ;;  %v1217_v15 = vpop.f32.mrb[1].mxu0  ;;  %v1407_v18 = vmax.f32 %v1215_v11, 0.0 }
 0x16e   : > { %v1330_v16 = vpop.f32.mrb[1].mxu1  ;;  %v1219_v14 = vpop.f32.mrb[2].mxu0  ;;  %v1409_v23 = vmax.f32 %v1328_v13, 0.0  ;;  %v1408_v24 = vmax.f32 %v1217_v15, 0.0 }
 0x16f   : > { %v1411_v19 = vmax.f32 %v1219_v14, 0.0  ;;  %v1332_v21 = vpop.f32.mrb[2].mxu1  ;;  %v1221_v22 = vpop.f32.mrb[3].mxu0  ;;  %v1410_v43 = vmax.f32 %v1330_v16, 0.0  ;;  %v1532_v16 = vld [vmem:[%s2954_s4 + $0x68] sm:$0xff] }
 0x170   : > { %v1413_v26 = vmax.f32 %v1332_v21, 0.0  ;;  %v1412_v28 = vmax.f32 %v1221_v22, 0.0  ;;  %v1334_v8 = vpop.f32.mrb[3].mxu1  ;;  %1602 = vperm.xlu1 %2424, %v1532_v16  }
 0x171   : > { %v1487_v10 = vpack.c.bf16 %v1411_v19, %v1407_v18  ;;  %v1414_v20 = vmax.f32 %v1334_v8, 0.0 }
 0x172   : > { %v1489_v6 = vpack.c.bf16 %v1413_v26, %v1409_v23  ;;  %v1488_v32 = vpack.c.bf16 %v1412_v28, %v1408_v24  ;;  %v1534_v23 = vld [vmem:[%s2954_s4 + $0x78] sm:$0xff] }
 0x173   : > { %v1490_v31 = vpack.c.bf16 %v1414_v20, %v1410_v43 }
 0x174   : > { %v1225_v33 = vpop.f32.mrb[4].mxu0  ;;  %1663 = vmatprep.subr.bf16.mxu0 %v1488_v32  ;;  %1612 = vperm.xlu1 %2424, %v1534_v23  }
 0x175   : > { %v1338_v29 = vpop.f32.mrb[4].mxu1  ;;  %1776 = vmatprep.subr.bf16.mxu1 %v1490_v31  ;;  %v1227_v35 = vpop.f32.mrb[5].mxu0  ;;  %1664 = vmatpush1.bf16.msra.mxu0 %v1487_v10  ;;  %v1415_v46 = vmax.f32 %v1225_v33, 0.0 }
 0x176   : > { %v1340_v44 = vpop.f32.mrb[5].mxu1  ;;  %1777 = vmatpush1.bf16.msra.mxu1 %v1489_v6  ;;  %v1229_v12 = vpop.f32.mrb[6].mxu0  ;;  %v1417_v47 = vmax.f32 %v1338_v29, 0.0  ;;  %v1416_v50 = vmax.f32 %v1227_v35, 0.0 }
 0x177   : > { %v1419_v48 = vmax.f32 %v1229_v12, 0.0  ;;  %v1342_v30 = vpop.f32.mrb[6].mxu1  ;;  %v1231_v9 = vpop.f32.mrb[7].mxu0  ;;  %v1418_v56 = vmax.f32 %v1340_v44, 0.0 }
 0x178   : > { %v1421_v52 = vmax.f32 %v1342_v30, 0.0  ;;  %v1420_v54 = vmax.f32 %v1231_v9, 0.0  ;;  %v1344_v55 = vpop.f32.mrb[7].mxu1 }
 0x179   : > { %v1491_v57 = vpack.c.bf16 %v1419_v48, %v1415_v46  ;;  %v1422_v58 = vmax.f32 %v1344_v55, 0.0 }
 0x17a   : > { %v1493_v49 = vpack.c.bf16 %v1421_v52, %v1417_v47  ;;  %v1492_v41 = vpack.c.bf16 %v1420_v54, %v1416_v50 }
 0x17b   : > { %v1494_v51 = vpack.c.bf16 %v1422_v58, %v1418_v56 }
 0x17c   : > { %v1235_v53 = vpop.f32.mrb[8].mxu0  ;;  %1665 = vmatprep.subr.bf16.mxu0 %v1492_v41 }
 0x17d   : > { %v1348_v60 = vpop.f32.mrb[8].mxu1  ;;  %1778 = vmatprep.subr.bf16.mxu1 %v1494_v51  ;;  %v1237_v61 = vpop.f32.mrb[9].mxu0  ;;  %1666 = vmatpush1.bf16.msra.mxu0 %v1491_v57  ;;  %v1423_v0 = vmax.f32 %v1235_v53, 0.0 }
 0x17e   : > { %v1350_v62 = vpop.f32.mrb[9].mxu1  ;;  %1779 = vmatpush1.bf16.msra.mxu1 %v1493_v49  ;;  %v1239_v63 = vpop.f32.mrb[10].mxu0  ;;  %v1425_v4 = vmax.f32 %v1348_v60, 0.0  ;;  %v1424_v5 = vmax.f32 %v1237_v61, 0.0 }
 0x17f   : > { %v1427_v1 = vmax.f32 %v1239_v63, 0.0  ;;  %v1352_v37 = vpop.f32.mrb[10].mxu1  ;;  %v1241_v38 = vpop.f32.mrb[11].mxu0  ;;  %v1426_v14 = vmax.f32 %v1350_v62, 0.0 }
 0x180   : > { %v1429_v11 = vmax.f32 %v1352_v37, 0.0  ;;  %v1428_v13 = vmax.f32 %v1241_v38, 0.0  ;;  %v1354_v15 = vpop.f32.mrb[11].mxu1 }
 0x181   : > { %v1495_v18 = vpack.c.bf16 %v1427_v1, %v1423_v0  ;;  %v1430_v19 = vmax.f32 %v1354_v15, 0.0 }
 0x182   : > { %v1497_v21 = vpack.c.bf16 %v1429_v11, %v1425_v4  ;;  %v1496_v22 = vpack.c.bf16 %v1428_v13, %v1424_v5 }
 0x183   : > { %v1498_v42 = vpack.c.bf16 %v1430_v19, %v1426_v14 }
 0x184   : > { %v1245_v40 = vpop.f32.mrb[12].mxu0  ;;  %1667 = vmatprep.subr.bf16.mxu0 %v1496_v22 }
 0x185   : > { %v1358_v24 = vpop.f32.mrb[12].mxu1  ;;  %1780 = vmatprep.subr.bf16.mxu1 %v1498_v42  ;;  %v1247_v26 = vpop.f32.mrb[13].mxu0  ;;  %1668 = vmatpush1.bf16.msra.mxu0 %v1495_v18  ;;  %v1431_v43 = vmax.f32 %v1245_v40, 0.0 }
 0x186   : > { %v1360_v28 = vpop.f32.mrb[13].mxu1  ;;  %1781 = vmatpush1.bf16.msra.mxu1 %v1497_v21  ;;  %v1249_v8 = vpop.f32.mrb[14].mxu0  ;;  %v1433_v32 = vmax.f32 %v1358_v24, 0.0  ;;  %v1432_v31 = vmax.f32 %v1247_v26, 0.0 }
 0x187   : > { %v1435_v10 = vmax.f32 %v1249_v8, 0.0  ;;  %v1362_v20 = vpop.f32.mrb[14].mxu1  ;;  %v1251_v6 = vpop.f32.mrb[15].mxu0  ;;  %v1434_v29 = vmax.f32 %v1360_v28, 0.0 }
 0x188   : > { %v1437_v39 = vmax.f32 %v1362_v20, 0.0  ;;  %v1436_v33 = vmax.f32 %v1251_v6, 0.0  ;;  %v1364_v34 = vpop.f32.mrb[15].mxu1 }
 0x189   : > { %v1499_v35 = vpack.c.bf16 %v1435_v10, %v1431_v43  ;;  %v1438_v44 = vmax.f32 %v1364_v34, 0.0 }
 0x18a   : > { %v1501_v12 = vpack.c.bf16 %v1437_v39, %v1433_v32  ;;  %v1500_v46 = vpack.c.bf16 %v1436_v33, %v1432_v31 }
 0x18b   : > { %v1502_v48 = vpack.c.bf16 %v1438_v44, %v1434_v29 }
 0x18c   : > { %v1255_v30 = vpop.f32.mrb[16].mxu0  ;;  %1669 = vmatprep.subr.bf16.mxu0 %v1500_v46 }
 0x18d   : > { %v1368_v9 = vpop.f32.mrb[16].mxu1  ;;  %1782 = vmatprep.subr.bf16.mxu1 %v1502_v48  ;;  %v1257_v45 = vpop.f32.mrb[17].mxu0  ;;  %1670 = vmatpush1.bf16.msra.mxu0 %v1499_v35  ;;  %v1439_v52 = vmax.f32 %v1255_v30, 0.0 }
 0x18e   : > { %v1370_v47 = vpop.f32.mrb[17].mxu1  ;;  %1783 = vmatpush1.bf16.msra.mxu1 %v1501_v12  ;;  %v1259_v50 = vpop.f32.mrb[18].mxu0  ;;  %v1441_v56 = vmax.f32 %v1368_v9, 0.0  ;;  %v1440_v57 = vmax.f32 %v1257_v45, 0.0 }
 0x18f   : > { %v1443_v54 = vmax.f32 %v1259_v50, 0.0  ;;  %v1372_v55 = vpop.f32.mrb[18].mxu1  ;;  %v1261_v36 = vpop.f32.mrb[19].mxu0  ;;  %v1442_v51 = vmax.f32 %v1370_v47, 0.0 }
 0x190   : > { %v1445_v58 = vmax.f32 %v1372_v55, 0.0  ;;  %v1444_v49 = vmax.f32 %v1261_v36, 0.0  ;;  %v1374_v41 = vpop.f32.mrb[19].mxu1 }
 0x191   : > { %v1503_v27 = vpack.c.bf16 %v1443_v54, %v1439_v52  ;;  %v1446_v53 = vmax.f32 %v1374_v41, 0.0 }
 0x192   : > { %v1505_v59 = vpack.c.bf16 %v1445_v58, %v1441_v56  ;;  %v1504_v60 = vpack.c.bf16 %v1444_v49, %v1440_v57 }
 0x193   : > { %v1506_v61 = vpack.c.bf16 %v1446_v53, %v1442_v51 }
 0x194   : > { %v1265_v62 = vpop.f32.mrb[20].mxu0  ;;  %1671 = vmatprep.subr.bf16.mxu0 %v1504_v60 }
 0x195   : > { %v1378_v63 = vpop.f32.mrb[20].mxu1  ;;  %1784 = vmatprep.subr.bf16.mxu1 %v1506_v61  ;;  %v1267_v0 = vpop.f32.mrb[21].mxu0  ;;  %1672 = vmatpush1.bf16.msra.mxu0 %v1503_v27  ;;  %v1447_v38 = vmax.f32 %v1265_v62, 0.0  ;;  %v2433_v62 = vld [vmem:[%s2953_s3] sm:$0xff]  }
 0x196   : > { %v1380_v1 = vpop.f32.mrb[21].mxu1  ;;  %1785 = vmatpush1.bf16.msra.mxu1 %v1505_v59  ;;  %v1269_v37 = vpop.f32.mrb[22].mxu0  ;;  %v1449_v11 = vmax.f32 %v1378_v63, 0.0  ;;  %v1448_v13 = vmax.f32 %v1267_v0, 0.0  ;;  %v2434_v63 = vld [vmem:[%s2953_s3 + $0x8] sm:$0xff]   ;;  %v2435_v0 = vld [vmem:[%s2953_s3 + $0x10] sm:$0xff]  }
 0x197   : > { %v1451_v3 = vmax.f32 %v1269_v37, 0.0  ;;  %v1382_v4 = vpop.f32.mrb[22].mxu1  ;;  %v1271_v5 = vpop.f32.mrb[23].mxu0  ;;  %v1450_v18 = vmax.f32 %v1380_v1, 0.0  ;;  %v2436_v1 = vld [vmem:[%s2953_s3 + $0x18] sm:$0xff]   ;;  %v2437_v37 = vld [vmem:[%s2953_s3 + $0x20] sm:$0xff]  }
 0x198   : > { %v1453_v15 = vmax.f32 %v1382_v4, 0.0  ;;  %v1452_v16 = vmax.f32 %v1271_v5, 0.0  ;;  %v1384_v14 = vpop.f32.mrb[23].mxu1  ;;  %v2440_v4 = vld [vmem:[%s2953_s3 + $0x38] sm:$0xff]   ;;  %v1538_v5 = vpop.permute.xlu0 %1537 }
 0x199   : > { %v1507_v19 = vpack.c.bf16 %v1451_v3, %v1447_v38  ;;  %v1454_v21 = vmax.f32 %v1384_v14, 0.0  ;;  %v2438_v38 = vld [vmem:[%s2953_s3 + $0x28] sm:$0xff]   ;;  %v2439_v3 = vld [vmem:[%s2953_s3 + $0x30] sm:$0xff]  }
 0x19a   : > { %v1509_v22 = vpack.c.bf16 %v1453_v15, %v1449_v11  ;;  %v1508_v42 = vpack.c.bf16 %v1452_v16, %v1448_v13  ;;  %v1548_v13 = vpop.permute.xlu1 %1547 }
 0x19b   : > { %v1510_v40 = vpack.c.bf16 %v1454_v21, %v1450_v18 }
 0x19c   : > { %v1275_v23 = vpop.f32.mrb[24].mxu0  ;;  %1673 = vmatprep.subr.bf16.mxu0 %v1508_v42  ;;  %v1543_v11 = vpop.permute.xlu0 %1542 }
 0x19d   : > { %v1388_v24 = vpop.f32.mrb[24].mxu1  ;;  %1786 = vmatprep.subr.bf16.mxu1 %v1510_v40  ;;  %v1277_v26 = vpop.f32.mrb[25].mxu0  ;;  %1674 = vmatpush1.bf16.msra.mxu0 %v1507_v19  ;;  %v1455_v43 = vmax.f32 %v1275_v23, 0.0 }
 0x19e   : > { %v1390_v28 = vpop.f32.mrb[25].mxu1  ;;  %1787 = vmatpush1.bf16.msra.mxu1 %v1509_v22  ;;  %v1279_v8 = vpop.f32.mrb[26].mxu0  ;;  %v1457_v32 = vmax.f32 %v1388_v24, 0.0  ;;  %v1456_v31 = vmax.f32 %v1277_v26, 0.0 }
 0x19f   : > { %v1459_v10 = vmax.f32 %v1279_v8, 0.0  ;;  %v1392_v20 = vpop.f32.mrb[26].mxu1  ;;  %v1281_v6 = vpop.f32.mrb[27].mxu0  ;;  %v1458_v29 = vmax.f32 %v1390_v28, 0.0 }
 0x1a0   : > { %v1461_v39 = vmax.f32 %v1392_v20, 0.0  ;;  %v1460_v33 = vmax.f32 %v1281_v6, 0.0  ;;  %v1394_v34 = vpop.f32.mrb[27].mxu1 }
 0x1a1   : > { %v1511_v35 = vpack.c.bf16 %v1459_v10, %v1455_v43  ;;  %v1462_v44 = vmax.f32 %v1394_v34, 0.0 }
 0x1a2   : > { %v1513_v12 = vpack.c.bf16 %v1461_v39, %v1457_v32  ;;  %v1512_v46 = vpack.c.bf16 %v1460_v33, %v1456_v31 }
 0x1a3   : > { %v1514_v48 = vpack.c.bf16 %v1462_v44, %v1458_v29 }
 0x1a4   : > { %v1285_v30 = vpop.f32.mrb[28].mxu0  ;;  %1675 = vmatprep.subr.bf16.mxu0 %v1512_v46 }
 0x1a5   : > { %v1398_v9 = vpop.f32.mrb[28].mxu1  ;;  %1788 = vmatprep.subr.bf16.mxu1 %v1514_v48  ;;  %v1287_v45 = vpop.f32.mrb[29].mxu0  ;;  %1676 = vmatpush1.bf16.msra.mxu0 %v1511_v35  ;;  %v1463_v52 = vmax.f32 %v1285_v30, 0.0 }
 0x1a6   : > { %v1400_v47 = vpop.f32.mrb[29].mxu1  ;;  %1789 = vmatpush1.bf16.msra.mxu1 %v1513_v12  ;;  %v1289_v50 = vpop.f32.mrb[30].mxu0  ;;  %v1465_v56 = vmax.f32 %v1398_v9, 0.0  ;;  %v1464_v57 = vmax.f32 %v1287_v45, 0.0 }
 0x1a7   : > { %v1467_v54 = vmax.f32 %v1289_v50, 0.0  ;;  %v1402_v55 = vpop.f32.mrb[30].mxu1  ;;  %v1291_v36 = vpop.f32.mrb[31].mxu0  ;;  %v1466_v51 = vmax.f32 %v1400_v47, 0.0 }
 0x1a8   : > { %v1469_v58 = vmax.f32 %v1402_v55, 0.0  ;;  %v1468_v49 = vmax.f32 %v1291_v36, 0.0  ;;  %v1404_v41 = vpop.f32.mrb[31].mxu1  ;;  %v1553_v35 = vpop.permute.xlu1 %1552 }
 0x1a9   : > { %v1515_v27 = vpack.c.bf16 %v1467_v54, %v1463_v52  ;;  %v1470_v53 = vmax.f32 %v1404_v41, 0.0 }
 0x1aa   : > { %v1517_v59 = vpack.c.bf16 %v1469_v58, %v1465_v56  ;;  %v1516_v60 = vpack.c.bf16 %v1468_v49, %v1464_v57 }
 0x1ab   : > { %v1518_v61 = vpack.c.bf16 %v1470_v53, %v1466_v51 }
 0x1ac   : > { %1677 = vmatprep.subr.bf16.mxu0 %v1516_v60 }
 0x1ad   : > { %1790 = vmatprep.subr.bf16.mxu1 %v1518_v61  ;;  %1678 = vmatpush1.bf16.msra.mxu0 %v1515_v27 }
 0x1ae   : > { %1791 = vmatpush1.bf16.msra.mxu1 %v1517_v59 }
 0x1b0   : > { %1696 = vmatmul.mubr.bf16.vlgmr.msra.gmra.mrb[32].mxu0 %v2433_v62 }
 0x1b1   : > { %1809 = vmatmul.mubr.bf16.vlgmr.msra.gmra.mrb[32].mxu1 %v2433_v62  ;;  %1705 = vmatprep.mubr.bf16.mxu0 %v2512_v7 }
 0x1b2   : > { %1818 = vmatprep.mubr.bf16.mxu1 %v2512_v7 }
 0x1b8   : > { %1706 = vmatmul.mubr.bf16.gmra.mrb[36].mxu0 %v2434_v63 }
 0x1b9   : > { %1819 = vmatmul.mubr.bf16.gmra.mrb[36].mxu1 %v2434_v63  ;;  %1715 = vmatprep.mubr.bf16.mxu0 %v2512_v7  ;;  %v1558_v63 = vpop.permute.xlu0 %1557 }
 0x1ba   : > { %1828 = vmatprep.mubr.bf16.mxu1 %v2512_v7 }
 0x1c0   : > { %1716 = vmatmul.mubr.bf16.gmra.mrb[40].mxu0 %v2435_v0 }
 0x1c1   : > { %1829 = vmatmul.mubr.bf16.gmra.mrb[40].mxu1 %v2435_v0  ;;  %1725 = vmatprep.mubr.bf16.mxu0 %v2512_v7 }
 0x1c2   : > { %1838 = vmatprep.mubr.bf16.mxu1 %v2512_v7 }
 0x1c8   : > { %1726 = vmatmul.mubr.bf16.gmra.mrb[44].mxu0 %v2436_v1 }
 0x1c9   : > { %1839 = vmatmul.mubr.bf16.gmra.mrb[44].mxu1 %v2436_v1  ;;  %1735 = vmatprep.mubr.bf16.mxu0 %v2512_v7 }
 0x1ca   : > { %1848 = vmatprep.mubr.bf16.mxu1 %v2512_v7 }
 0x1d0   : > { %1736 = vmatmul.mubr.bf16.gmra.mrb[48].mxu0 %v2437_v37 }
 0x1d1   : > { %1849 = vmatmul.mubr.bf16.gmra.mrb[48].mxu1 %v2437_v37  ;;  %1745 = vmatprep.mubr.bf16.mxu0 %v2512_v7 }
 0x1d2   : > { %1858 = vmatprep.mubr.bf16.mxu1 %v2512_v7 }
 0x1d8   : > { %1746 = vmatmul.mubr.bf16.gmra.mrb[52].mxu0 %v2438_v38 }
 0x1d9   : > { %1859 = vmatmul.mubr.bf16.gmra.mrb[52].mxu1 %v2438_v38  ;;  %1755 = vmatprep.mubr.bf16.mxu0 %v2512_v7  ;;  %v1563_v38 = vpop.permute.xlu1 %1562 }
 0x1da   : > { %1868 = vmatprep.mubr.bf16.mxu1 %v2512_v7 }
 0x1e0   : > { %1756 = vmatmul.mubr.bf16.gmra.mrb[56].mxu0 %v2439_v3 }
 0x1e1   : > { %1869 = vmatmul.mubr.bf16.gmra.mrb[56].mxu1 %v2439_v3  ;;  %1765 = vmatprep.mubr.bf16.mxu0 %v2512_v7 }
 0x1e2   : > { %1878 = vmatprep.mubr.bf16.mxu1 %v2512_v7 }
 0x1e8   : > { %1766 = vmatmul.mubr.bf16.gmra.mrb[60].mxu0 %v2440_v4 }
 0x1e9   : > { %1879 = vmatmul.mubr.bf16.gmra.mrb[60].mxu1 %v2440_v4  ;;  %2028 = vmatprep.mubr.bf16.mxu0 %v2512_v7 }
 0x1ea   : > { %2069 = vmatprep.mubr.bf16.mxu1 %v2512_v7 }
 0x283   : > { %v1697_v15 = vpop.f32.mrb[32].mxu0 }
 0x284   : > { %v1698_v16 = vadd.f32 %v1697_v15, %v1538_v5  ;;  %v1810_v14 = vpop.f32.mrb[32].mxu1  ;;  %v1699_v18 = vpop.f32.mrb[33].mxu0 }
 0x285   : > { %v1811_v19 = vadd.f32 %v1810_v14, %v1538_v5  ;;  %v1700_v21 = vadd.f32 %v1699_v18, %v1538_v5  ;;  %v1812_v22 = vpop.f32.mrb[33].mxu1  ;;  %v1701_v42 = vpop.f32.mrb[34].mxu0 }
 0x286   : > { %v1813_v40 = vadd.f32 %v1812_v22, %v1538_v5  ;;  %v1702_v23 = vadd.f32 %v1701_v42, %v1543_v11  ;;  %v1814_v24 = vpop.f32.mrb[34].mxu1  ;;  %v1703_v26 = vpop.f32.mrb[35].mxu0  ;;  %v1889_v10 = vmax.f32 %v1698_v16, 0.0 }
 0x287   : > { %v1815_v28 = vadd.f32 %v1814_v24, %v1543_v11  ;;  %v1704_v8 = vadd.f32 %v1703_v26, %v1543_v11  ;;  %v1816_v43 = vpop.f32.mrb[35].mxu1  ;;  %v1891_v6 = vmax.f32 %v1811_v19, 0.0  ;;  %v1890_v32 = vmax.f32 %v1700_v21, 0.0 }
 0x288   : > { %v1893_v7 = vmax.f32 %v1702_v23, 0.0  ;;  %v1817_v20 = vadd.f32 %v1816_v43, %v1543_v11  ;;  %v1892_v33 = vmax.f32 %v1813_v40, 0.0 }
 0x289   : > { %v1895_v31 = vmax.f32 %v1815_v28, 0.0  ;;  %v1894_v39 = vmax.f32 %v1704_v8, 0.0 }
 0x28a   : > { %v1954_v34 = vpack.c.bf16 %v1893_v7, %v1889_v10  ;;  %v1896_v29 = vmax.f32 %v1817_v20, 0.0 }
 0x28b   : > { %v1956_v44 = vpack.c.bf16 %v1895_v31, %v1891_v6  ;;  %v1955_v12 = vpack.c.bf16 %v1894_v39, %v1890_v32  ;;  %v1707_v46 = vpop.f32.mrb[36].mxu0  ;;  %v1568_v31 = vpop.permute.xlu0 %1567 }
 0x28c   : > { %v1957_v48 = vpack.c.bf16 %v1896_v29, %v1892_v33  ;;  %v1708_v30 = vadd.f32 %v1707_v46, %v1548_v13  ;;  %v1820_v9 = vpop.f32.mrb[36].mxu1  ;;  %v1709_v45 = vpop.f32.mrb[37].mxu0 }
 0x28d   : > { %v1821_v47 = vadd.f32 %v1820_v9, %v1548_v13  ;;  %v1710_v50 = vadd.f32 %v1709_v45, %v1548_v13  ;;  %v1822_v52 = vpop.f32.mrb[37].mxu1  ;;  %v1711_v54 = vpop.f32.mrb[38].mxu0  ;;  %1996 = vmatprep.subr.bf16.mxu0 %v1955_v12 }
 0x28e   : > { %v1823_v55 = vadd.f32 %v1822_v52, %v1548_v13  ;;  %v1712_v36 = vadd.f32 %v1711_v54, %v1553_v35  ;;  %v1824_v56 = vpop.f32.mrb[38].mxu1  ;;  %2037 = vmatprep.subr.bf16.mxu1 %v1957_v48  ;;  %v1713_v57 = vpop.f32.mrb[39].mxu0  ;;  %1997 = vmatpush1.bf16.msra.mxu0 %v1954_v34  ;;  %v1897_v51 = vmax.f32 %v1708_v30, 0.0 }
 0x28f   : > { %v1825_v58 = vadd.f32 %v1824_v56, %v1553_v35  ;;  %v1714_v49 = vadd.f32 %v1713_v57, %v1553_v35  ;;  %v1826_v41 = vpop.f32.mrb[39].mxu1  ;;  %2038 = vmatpush1.bf16.msra.mxu1 %v1956_v44  ;;  %v1899_v59 = vmax.f32 %v1821_v47, 0.0  ;;  %v1898_v60 = vmax.f32 %v1710_v50, 0.0  ;;  %v1573_v29 = vpop.permute.xlu1 %1572 }
 0x290   : > { %v1901_v27 = vmax.f32 %v1712_v36, 0.0  ;;  %v1827_v53 = vadd.f32 %v1826_v41, %v1553_v35  ;;  %v1900_v0 = vmax.f32 %v1823_v55, 0.0 }
 0x291   : > { %v1903_v61 = vmax.f32 %v1825_v58, 0.0  ;;  %v1902_v62 = vmax.f32 %v1714_v49, 0.0 }
 0x292   : > { %v1958_v1 = vpack.c.bf16 %v1901_v27, %v1897_v51  ;;  %v1904_v37 = vmax.f32 %v1827_v53, 0.0 }
 0x293   : > { %v1960_v3 = vpack.c.bf16 %v1903_v61, %v1899_v59  ;;  %v1959_v4 = vpack.c.bf16 %v1902_v62, %v1898_v60  ;;  %v1717_v5 = vpop.f32.mrb[40].mxu0  ;;  %v1578_v62 = vpop.permute.xlu0 %1577 }
 0x294   : > { %v1961_v11 = vpack.c.bf16 %v1904_v37, %v1900_v0  ;;  %v1718_v13 = vadd.f32 %v1717_v5, %v1558_v63  ;;  %v1830_v15 = vpop.f32.mrb[40].mxu1  ;;  %v1719_v16 = vpop.f32.mrb[41].mxu0 }
 0x295   : > { %v1831_v14 = vadd.f32 %v1830_v15, %v1558_v63  ;;  %v1720_v18 = vadd.f32 %v1719_v16, %v1558_v63  ;;  %v1832_v19 = vpop.f32.mrb[41].mxu1  ;;  %v1721_v21 = vpop.f32.mrb[42].mxu0  ;;  %1998 = vmatprep.subr.bf16.mxu0 %v1959_v4 }
 0x296   : > { %v1833_v22 = vadd.f32 %v1832_v19, %v1558_v63  ;;  %v1722_v42 = vadd.f32 %v1721_v21, %v1563_v38  ;;  %v1834_v40 = vpop.f32.mrb[42].mxu1  ;;  %2039 = vmatprep.subr.bf16.mxu1 %v1961_v11  ;;  %v1723_v23 = vpop.f32.mrb[43].mxu0  ;;  %1999 = vmatpush1.bf16.msra.mxu0 %v1958_v1  ;;  %v1905_v8 = vmax.f32 %v1718_v13, 0.0 }
 0x297   : > { %v1835_v24 = vadd.f32 %v1834_v40, %v1563_v38  ;;  %v1724_v26 = vadd.f32 %v1723_v23, %v1563_v38  ;;  %v1836_v28 = vpop.f32.mrb[43].mxu1  ;;  %2040 = vmatpush1.bf16.msra.mxu1 %v1960_v3  ;;  %v1907_v7 = vmax.f32 %v1831_v14, 0.0  ;;  %v1906_v20 = vmax.f32 %v1720_v18, 0.0  ;;  %v1583_v37 = vpop.permute.xlu1 %1582 }
 0x298   : > { %v1909_v43 = vmax.f32 %v1722_v42, 0.0  ;;  %v1837_v10 = vadd.f32 %v1836_v28, %v1563_v38  ;;  %v1908_v39 = vmax.f32 %v1833_v22, 0.0 }
 0x299   : > { %v1911_v6 = vmax.f32 %v1835_v24, 0.0  ;;  %v1910_v32 = vmax.f32 %v1724_v26, 0.0 }
 0x29a   : > { %v1962_v33 = vpack.c.bf16 %v1909_v43, %v1905_v8  ;;  %v1912_v34 = vmax.f32 %v1837_v10, 0.0 }
 0x29b   : > { %v1964_v35 = vpack.c.bf16 %v1911_v6, %v1907_v7  ;;  %v1963_v44 = vpack.c.bf16 %v1910_v32, %v1906_v20  ;;  %v1727_v12 = vpop.f32.mrb[44].mxu0  ;;  %v1588_v32 = vpop.permute.xlu0 %1587 }
 0x29c   : > { %v1965_v46 = vpack.c.bf16 %v1912_v34, %v1908_v39  ;;  %v1728_v48 = vadd.f32 %v1727_v12, %v1568_v31  ;;  %v1840_v30 = vpop.f32.mrb[44].mxu1  ;;  %v1729_v9 = vpop.f32.mrb[45].mxu0 }
 0x29d   : > { %v1841_v45 = vadd.f32 %v1840_v30, %v1568_v31  ;;  %v1730_v47 = vadd.f32 %v1729_v9, %v1568_v31  ;;  %v1842_v50 = vpop.f32.mrb[45].mxu1  ;;  %v1731_v52 = vpop.f32.mrb[46].mxu0  ;;  %2000 = vmatprep.subr.bf16.mxu0 %v1963_v44 }
 0x29e   : > { %v1843_v54 = vadd.f32 %v1842_v50, %v1568_v31  ;;  %v1732_v55 = vadd.f32 %v1731_v52, %v1573_v29  ;;  %v1844_v36 = vpop.f32.mrb[46].mxu1  ;;  %2041 = vmatprep.subr.bf16.mxu1 %v1965_v46  ;;  %v1733_v56 = vpop.f32.mrb[47].mxu0  ;;  %2001 = vmatpush1.bf16.msra.mxu0 %v1962_v33  ;;  %v1913_v41 = vmax.f32 %v1728_v48, 0.0 }
 0x29f   : > { %v1845_v57 = vadd.f32 %v1844_v36, %v1573_v29  ;;  %v1734_v58 = vadd.f32 %v1733_v56, %v1573_v29  ;;  %v1846_v49 = vpop.f32.mrb[47].mxu1  ;;  %2042 = vmatpush1.bf16.msra.mxu1 %v1964_v35  ;;  %v1915_v53 = vmax.f32 %v1841_v45, 0.0  ;;  %v1914_v59 = vmax.f32 %v1730_v47, 0.0  ;;  %v1593_v34 = vpop.permute.xlu1 %1592 }
 0x2a0   : > { %v1917_v51 = vmax.f32 %v1732_v55, 0.0  ;;  %v1847_v27 = vadd.f32 %v1846_v49, %v1573_v29  ;;  %v1916_v63 = vmax.f32 %v1843_v54, 0.0 }
 0x2a1   : > { %v1919_v60 = vmax.f32 %v1845_v57, 0.0  ;;  %v1918_v61 = vmax.f32 %v1734_v58, 0.0 }
 0x2a2   : > { %v1966_v0 = vpack.c.bf16 %v1917_v51, %v1913_v41  ;;  %v1920_v1 = vmax.f32 %v1847_v27, 0.0 }
 0x2a3   : > { %v1968_v38 = vpack.c.bf16 %v1919_v60, %v1915_v53  ;;  %v1967_v3 = vpack.c.bf16 %v1918_v61, %v1914_v59  ;;  %v1737_v4 = vpop.f32.mrb[48].mxu0  ;;  %v1598_v61 = vpop.permute.xlu0 %1597 }
 0x2a4   : > { %v1969_v5 = vpack.c.bf16 %v1920_v1, %v1916_v63  ;;  %v1738_v11 = vadd.f32 %v1737_v4, %v1578_v62  ;;  %v1850_v13 = vpop.f32.mrb[48].mxu1  ;;  %v1739_v15 = vpop.f32.mrb[49].mxu0 }
 0x2a5   : > { %v1851_v16 = vadd.f32 %v1850_v13, %v1578_v62  ;;  %v1740_v14 = vadd.f32 %v1739_v15, %v1578_v62  ;;  %v1852_v18 = vpop.f32.mrb[49].mxu1  ;;  %v1741_v19 = vpop.f32.mrb[50].mxu0  ;;  %2002 = vmatprep.subr.bf16.mxu0 %v1967_v3 }
 0x2a6   : > { %v1853_v21 = vadd.f32 %v1852_v18, %v1578_v62  ;;  %v1742_v22 = vadd.f32 %v1741_v19, %v1583_v37  ;;  %v1854_v42 = vpop.f32.mrb[50].mxu1  ;;  %2043 = vmatprep.subr.bf16.mxu1 %v1969_v5  ;;  %v1743_v40 = vpop.f32.mrb[51].mxu0  ;;  %2003 = vmatpush1.bf16.msra.mxu0 %v1966_v0  ;;  %v1921_v28 = vmax.f32 %v1738_v11, 0.0 }
 0x2a7   : > { %v1855_v23 = vadd.f32 %v1854_v42, %v1583_v37  ;;  %v1744_v24 = vadd.f32 %v1743_v40, %v1583_v37  ;;  %v1856_v26 = vpop.f32.mrb[51].mxu1  ;;  %2044 = vmatpush1.bf16.msra.mxu1 %v1968_v38  ;;  %v1923_v10 = vmax.f32 %v1851_v16, 0.0  ;;  %v1922_v7 = vmax.f32 %v1740_v14, 0.0  ;;  %v1603_v1 = vpop.permute.xlu1 %1602 }
 0x2a8   : > { %v1925_v8 = vmax.f32 %v1742_v22, 0.0  ;;  %v1857_v43 = vadd.f32 %v1856_v26, %v1583_v37  ;;  %v1924_v31 = vmax.f32 %v1853_v21, 0.0 }
 0x2a9   : > { %v1927_v20 = vmax.f32 %v1855_v23, 0.0  ;;  %v1926_v6 = vmax.f32 %v1744_v24, 0.0 }
 0x2aa   : > { %v1970_v39 = vpack.c.bf16 %v1925_v8, %v1921_v28  ;;  %v1928_v33 = vmax.f32 %v1857_v43, 0.0 }
 0x2ab   : > { %v1972_v29 = vpack.c.bf16 %v1927_v20, %v1923_v10  ;;  %v1971_v35 = vpack.c.bf16 %v1926_v6, %v1922_v7  ;;  %v1747_v44 = vpop.f32.mrb[52].mxu0  ;;  %v1608_v6 = vpop.permute.xlu0 %1607 }
 0x2ac   : > { %v1973_v12 = vpack.c.bf16 %v1928_v33, %v1924_v31  ;;  %v1748_v46 = vadd.f32 %v1747_v44, %v1588_v32  ;;  %v1860_v48 = vpop.f32.mrb[52].mxu1  ;;  %v1749_v30 = vpop.f32.mrb[53].mxu0 }
 0x2ad   : > { %v1861_v9 = vadd.f32 %v1860_v48, %v1588_v32  ;;  %v1750_v45 = vadd.f32 %v1749_v30, %v1588_v32  ;;  %v1862_v47 = vpop.f32.mrb[53].mxu1  ;;  %v1751_v50 = vpop.f32.mrb[54].mxu0  ;;  %2004 = vmatprep.subr.bf16.mxu0 %v1971_v35 }
 0x2ae   : > { %v1863_v52 = vadd.f32 %v1862_v47, %v1588_v32  ;;  %v1752_v54 = vadd.f32 %v1751_v50, %v1593_v34  ;;  %v1864_v55 = vpop.f32.mrb[54].mxu1  ;;  %2045 = vmatprep.subr.bf16.mxu1 %v1973_v12  ;;  %v1753_v36 = vpop.f32.mrb[55].mxu0  ;;  %2005 = vmatpush1.bf16.msra.mxu0 %v1970_v39  ;;  %v1929_v49 = vmax.f32 %v1748_v46, 0.0 }
 0x2af   : > { %v1865_v56 = vadd.f32 %v1864_v55, %v1593_v34  ;;  %v1754_v57 = vadd.f32 %v1753_v36, %v1593_v34  ;;  %v1866_v58 = vpop.f32.mrb[55].mxu1  ;;  %2046 = vmatpush1.bf16.msra.mxu1 %v1972_v29  ;;  %v1931_v27 = vmax.f32 %v1861_v9, 0.0  ;;  %v1930_v53 = vmax.f32 %v1750_v45, 0.0  ;;  %v1613_v33 = vpop.permute.xlu1 %1612 }
 0x2b0   : > { %v1933_v41 = vmax.f32 %v1752_v54, 0.0  ;;  %v1867_v51 = vadd.f32 %v1866_v58, %v1593_v34  ;;  %v1932_v62 = vmax.f32 %v1863_v52, 0.0 }
 0x2b1   : > { %v1935_v59 = vmax.f32 %v1865_v56, 0.0  ;;  %v1934_v60 = vmax.f32 %v1754_v57, 0.0 }
 0x2b2   : > { %v1974_v63 = vpack.c.bf16 %v1933_v41, %v1929_v49  ;;  %v1936_v0 = vmax.f32 %v1867_v51, 0.0 }
 0x2b3   : > { %v1976_v37 = vpack.c.bf16 %v1935_v59, %v1931_v27  ;;  %v1975_v38 = vpack.c.bf16 %v1934_v60, %v1930_v53  ;;  %v1757_v3 = vpop.f32.mrb[56].mxu0 }
 0x2b4   : > { %v1977_v4 = vpack.c.bf16 %v1936_v0, %v1932_v62  ;;  %v1758_v5 = vadd.f32 %v1757_v3, %v1598_v61  ;;  %v1870_v11 = vpop.f32.mrb[56].mxu1  ;;  %v1759_v13 = vpop.f32.mrb[57].mxu0 }
 0x2b5   : > { %v1871_v15 = vadd.f32 %v1870_v11, %v1598_v61  ;;  %v1760_v16 = vadd.f32 %v1759_v13, %v1598_v61  ;;  %v1872_v14 = vpop.f32.mrb[57].mxu1  ;;  %v1761_v18 = vpop.f32.mrb[58].mxu0  ;;  %2006 = vmatprep.subr.bf16.mxu0 %v1975_v38  ;;  %v1994_v38 = vsub.s32 0, %v2649_v17 }
 0x2b6   : > { %v1873_v19 = vadd.f32 %v1872_v14, %v1598_v61  ;;  %v1762_v21 = vadd.f32 %v1761_v18, %v1603_v1  ;;  %v1874_v22 = vpop.f32.mrb[58].mxu1  ;;  %2047 = vmatprep.subr.bf16.mxu1 %v1977_v4  ;;  %v1763_v42 = vpop.f32.mrb[59].mxu0  ;;  %2007 = vmatpush1.bf16.msra.mxu0 %v1974_v63  ;;  %v1937_v26 = vmax.f32 %v1758_v5, 0.0 }
 0x2b7   : > { %v1875_v40 = vadd.f32 %v1874_v22, %v1603_v1  ;;  %v1764_v23 = vadd.f32 %v1763_v42, %v1603_v1  ;;  %v1876_v24 = vpop.f32.mrb[59].mxu1  ;;  %2048 = vmatpush1.bf16.msra.mxu1 %v1976_v37  ;;  %v1939_v43 = vmax.f32 %v1871_v15, 0.0  ;;  %v1938_v10 = vmax.f32 %v1760_v16, 0.0  ;;  %v1953_v37 = vld [vmem:[%s2955_s5] sm:$0x1]  ;;  %v1990_v3 = vpop.permute.xlu0 %1989 }
 0x2b8   : > { %v1941_v28 = vmax.f32 %v1762_v21, 0.0  ;;  %v1877_v8 = vadd.f32 %v1876_v24, %v1603_v1  ;;  %v1940_v32 = vmax.f32 %v1873_v19, 0.0  ;;  %v1995_v4 = vrot.slane %v1990_v3, %v1994_v38 }
 0x2b9   : > { %v1943_v7 = vmax.f32 %v1875_v40, 0.0  ;;  %v1942_v20 = vmax.f32 %v1764_v23, 0.0 }
 0x2ba   : > { %v1978_v31 = vpack.c.bf16 %v1941_v28, %v1937_v26  ;;  %v1944_v39 = vmax.f32 %v1877_v8, 0.0 }
 0x2bb   : > { %v1980_v34 = vpack.c.bf16 %v1943_v7, %v1939_v43  ;;  %v1979_v29 = vpack.c.bf16 %v1942_v20, %v1938_v10  ;;  %v1767_v35 = vpop.f32.mrb[60].mxu0 }
 0x2bc   : > { %v1981_v44 = vpack.c.bf16 %v1944_v39, %v1940_v32  ;;  %v1768_v12 = vadd.f32 %v1767_v35, %v1608_v6  ;;  %v1880_v46 = vpop.f32.mrb[60].mxu1  ;;  %v1769_v48 = vpop.f32.mrb[61].mxu0 }
 0x2bd   : > { %v1881_v30 = vadd.f32 %v1880_v46, %v1608_v6  ;;  %v1770_v9 = vadd.f32 %v1769_v48, %v1608_v6  ;;  %v1882_v45 = vpop.f32.mrb[61].mxu1  ;;  %v1771_v47 = vpop.f32.mrb[62].mxu0  ;;  %2008 = vmatprep.subr.bf16.mxu0 %v1979_v29 }
 0x2be   : > { %v1883_v50 = vadd.f32 %v1882_v45, %v1608_v6  ;;  %v1772_v52 = vadd.f32 %v1771_v47, %v1613_v33  ;;  %v1884_v54 = vpop.f32.mrb[62].mxu1  ;;  %2049 = vmatprep.subr.bf16.mxu1 %v1981_v44  ;;  %v1773_v55 = vpop.f32.mrb[63].mxu0  ;;  %2009 = vmatpush1.bf16.msra.mxu0 %v1978_v31  ;;  %v1945_v58 = vmax.f32 %v1768_v12, 0.0 }
 0x2bf   : > { %v1885_v36 = vadd.f32 %v1884_v54, %v1613_v33  ;;  %v1774_v56 = vadd.f32 %v1773_v55, %v1613_v33  ;;  %v1886_v57 = vpop.f32.mrb[63].mxu1  ;;  %2050 = vmatpush1.bf16.msra.mxu1 %v1980_v34  ;;  %v1947_v51 = vmax.f32 %v1881_v30, 0.0  ;;  %v1946_v27 = vmax.f32 %v1770_v9, 0.0 }
 0x2c0   : > { %v1949_v49 = vmax.f32 %v1772_v52, 0.0  ;;  %v1887_v41 = vadd.f32 %v1886_v57, %v1613_v33  ;;  %v1948_v60 = vmax.f32 %v1883_v50, 0.0 }
 0x2c1   : > { %v1951_v53 = vmax.f32 %v1885_v36, 0.0  ;;  %v1950_v59 = vmax.f32 %v1774_v56, 0.0 }
 0x2c2   : > { %v1982_v61 = vpack.c.bf16 %v1949_v49, %v1945_v58  ;;  %v1952_v62 = vmax.f32 %v1887_v41, 0.0 }
 0x2c3   : > { %v1984_v63 = vpack.c.bf16 %v1951_v53, %v1947_v51  ;;  %v1983_v0 = vpack.c.bf16 %v1950_v59, %v1946_v27 }
 0x2c4   : > { %v1985_v1 = vpack.c.bf16 %v1952_v62, %v1948_v60 }
 0x2c5   : > { %2010 = vmatprep.subr.bf16.mxu0 %v1983_v0 }
 0x2c6   : > { %2051 = vmatprep.subr.bf16.mxu1 %v1985_v1  ;;  %2011 = vmatpush1.bf16.msra.mxu0 %v1982_v61 }
 0x2c7   : > { %2052 = vmatpush1.bf16.msra.mxu1 %v1984_v63 }
 0x2c9   : > { %2029 = vmatmul.mubr.bf16.vlgmr.msra.gmra.mrb[64].mxu0 %v1953_v37 }
 0x2ca   : > { %2070 = vmatmul.mubr.bf16.vlgmr.msra.gmra.mrb[64].mxu1 %v1953_v37 }
 0x39c   : > { %v2030_v5 = vpop.f32.mrb[64].mxu0 }
 0x39d   : > { %v2031_v11 = vadd.f32 %v2030_v5, %v1995_v4  ;;  %v2071_v13 = vpop.f32.mrb[64].mxu1  ;;  %v2032_v15 = vpop.f32.mrb[65].mxu0 }
 0x39e   : > { %v2072_v16 = vadd.f32 %v2071_v13, %v1995_v4  ;;  %v2033_v14 = vadd.f32 %v2032_v15, %v1995_v4  ;;  %v2073_v18 = vpop.f32.mrb[65].mxu1  ;;  %v2034_v19 = vpop.f32.mrb[66].mxu0 }
 0x39f   : > { %v2361_v21 = vmul.f32 -1.442695, %v2031_v11  ;;  %v2074_v22 = vadd.f32 %v2073_v18, %v1995_v4  ;;  %v2075_v42 = vpop.f32.mrb[66].mxu1  ;;  %v2035_v40 = vpop.f32.mrb[67].mxu0 }
 0x3a0   : > { %v2363_v23 = vmul.f32 -1.442695, %v2072_v16  ;;  %v2362_v24 = vmul.f32 -1.442695, %v2033_v14  ;;  %v2076_v26 = vpop.f32.mrb[67].mxu1 }
 0x3a1   : > { %2449 = vpow2.f32 %v2361_v21  ;;  %v2364_v28 = vmul.f32 -1.442695, %v2074_v22 }
 0x3a2   : > { %2451 = vpow2.f32 %v2363_v23 }
 0x3a3   : > { %2453 = vpow2.f32 %v2362_v24 }
 0x3a4   : > { %2455 = vpow2.f32 %v2364_v28 }
 0x3ab   : > { %v2450_v17 = vpop.eup %2449 }
 0x3ac   : > { %v2452_v8 = vpop.eup %2451  ;;  %v2090_v43 = vadd.f32 1.0, %v2450_v17 }
 0x3ad   : > { %v2454_v10 = vpop.eup %2453  ;;  %v2092_v7 = vadd.f32 1.0, %v2452_v8 }
 0x3ae   : > { %v2456_v20 = vpop.eup %2455  ;;  %2457 = vrcp.f32 %v2090_v43  ;;  %v2091_v6 = vadd.f32 1.0, %v2454_v10 }
 0x3af   : > { %2459 = vrcp.f32 %v2092_v7  ;;  %v2093_v32 = vadd.f32 1.0, %v2456_v20 }
 0x3b0   : > { %2461 = vrcp.f32 %v2091_v6 }
 0x3b1   : > { %2463 = vrcp.f32 %v2093_v32 }
 0x3b8   : > { %v2458_v31 = vpop.eup %2457 }
 0x3b9   : > { %v2460_v39 = vpop.eup %2459 }
 0x3ba   : > { %v2462_v33 = vpop.eup %2461 }
 0x3bb   : > { %v2464_v34 = vpop.eup %2463  ;;  %v2106_v29 = vcombine.low %v2458_v31, %v2462_v33 }
 0x3bc   : > { %v2107_v35 = vcombine.low %v2460_v39, %v2464_v34 }
 0x3bd   : > { %v2114_v44 = vrot.slane %v2106_v29, %v2654_v25 }
 0x3be   : > { %v2121_v12 = vrot.slane %v2107_v35, %v2654_v25 }
 0x3c0   : > { %v2122_v46 = vcombine.low %v2114_v44, %v2121_v12 }
 0x3c2   : > { %v2129_v48 = vrot.slane %v2122_v46, %v2654_v25 }
 0x3c4   : > { %2131 = vst.msk [vmem:[%s401_s12] sm:$0xf] %vm2616_vm0, %v2129_v48 }
 0x3c5 PF: > { %s22_s9 = sadd.s32 1, %s2506_s9   ;;  %s2963_s29 = smov %s2502_s30 }
 0x3c6   : > { %p19_p2 = scmp.ge.s32.totalorder %s22_s9, 4   ;;  %s2964_s30 = smov %s2966_s10 }
 0x3c8   :  { %21 = sbr.rel (!%p19_p2) target bundleno = 5 (0x5), region = 104 }
 0x3cf   :  { %2185 = vsyncpa [#allocation5], 1 }
 0x3d0   :  { %2187 = vsyncpa [#allocation5 + $0x1], 1 }

</bundles_post_ra>
